<compile_context>
chip_gen: v7x
topology: tpu7x:2x2x1
jax: 0.10.0
libtpu: 0.0.40
codegen_flags: <defaults>
</compile_context>

<pallas_src>
import functools

import jax
import jax.numpy as jnp
from jax.experimental import pallas as pl
from jax.experimental.pallas import tpu as pltpu

_ALIGN = 16  # sublane alignment used for row padding / tile sizes (bf16-friendly)


def _round_up(x, m):
    return (x + m - 1) // m * m


def _cdiv(a, b):
    return -(-a // b)


# ----------------------------- Pallas kernels --------------------------------

def _activation(y, act):
    if act == "relu":
        return jnp.maximum(y, 0.0)
    if act == "silu":
        return y * jax.nn.sigmoid(y)
    return y


def _conv_kernel_resident(x_ref, w_ref, b_ref, o_ref, *, row_offsets, act):
    # stride == 1 path.
    # x_ref: (L, KW*C)      bf16, whole row-flattened padded image with KW folded into channels
    # w_ref: (KH, KW*C, OCp) bf16, BN-scale-folded weight, one slab per kh tap
    # b_ref: (1, OCp)        f32, folded bias (zeros in OC padding)
    # o_ref: (TM, OCp)       f32 output tile (full padded-width rows, lane-dense channels)
    tm = o_ref.shape[0]
    base = pl.program_id(1) * tm          # tm and all row_offsets are multiples of 16
    acc = None
    for t, off in enumerate(row_offsets):  # static, short (KH) unrolled loop
        start = pl.multiple_of(base + off, _ALIGN)
        d = jnp.dot(x_ref[pl.ds(start, tm), :], w_ref[t],
                    preferred_element_type=jnp.float32)
        acc = d if acc is None else acc + d
    o_ref[...] = _activation(acc + b_ref[...], act).astype(o_ref.dtype)


def _conv_kernel_gathered(x_ref, w_ref, b_ref, o_ref, *, act):
    # stride > 1 path: rows were pre-gathered per kh tap in the wrapper.
    # x_ref: (KH, TM, KW*C) bf16, w_ref: (KH, KW*C, OCp) bf16, b_ref: (1, OCp) f32
    acc = None
    for kh in range(x_ref.shape[0]):       # static, short (KH) unrolled loop
        d = jnp.dot(x_ref[kh], w_ref[kh], preferred_element_type=jnp.float32)
        acc = d if acc is None else acc + d
    o_ref[...] = _activation(acc + b_ref[...], act).astype(o_ref.dtype)


# ----------------------------- compiler params --------------------------------

def _mosaic_params(buffer_bytes):
    try:
        cap = int(pltpu.get_tpu_info().vmem_capacity_bytes)
    except Exception:
        cap = 64 * 1024 * 1024
    limit = int(buffer_bytes * 1.5) + (2 << 20)
    limit = max(32 << 20, min(limit, int(cap * 0.9)))
    return pltpu.CompilerParams(
        dimension_semantics=("parallel", "parallel"),   # shards across v7x's 2 TensorCores
        vmem_limit_bytes=limit)


# ----------------------------- ConvModule wrapper ----------------------------

def conv_module_forward(x_nchw, params, *, stride=1, padding=0, act=None,
                        use_bn=False, bn_eps=1e-5, groups=1, tm=1024):
    """ConvModule forward. x_nchw: (N, C, H, W) f32 -> (N, OC, OH, OW) f32."""
    if groups != 1:
        # TODO(synk): grouped conv not implemented in the Pallas path.
        raise NotImplementedError("groups > 1 is not supported")

    N, C, H, W = x_nchw.shape
    weight = params["weight"]                         # (OC, C, KH, KW)
    OC, _, KH, KW = weight.shape
    Hp, Wp = H + 2 * padding, W + 2 * padding
    OH = (Hp - KH) // stride + 1
    OW = (Wp - KW) // stride + 1
    Wpa = _round_up(Wp, _ALIGN)                       # aligned flattened row width
    KWC = KW * C
    OCp = _round_up(max(OC, 128), 128)

    # ---- fold BN (eval) / conv bias into per-channel scale & bias (in f32) ----
    if use_bn:
        scale = params["bn_gamma"] * jax.lax.rsqrt(params["bn_var"] + bn_eps)
        bias = params["bn_beta"] - params["bn_mean"] * scale   # conv bias absent with norm
    else:
        scale = jnp.ones((OC,), jnp.float32)
        bias = params.get("bias", jnp.zeros((OC,), jnp.float32))

    # ---- weight: fold scale, reorder to (KH, KW*C, OCp), pad OC to lane width, bf16 ----
    w = weight.astype(jnp.float32) * scale[:, None, None, None]
    w = jnp.transpose(w, (2, 3, 1, 0)).reshape(KH, KWC, OC)    # [kh, kw*C + c, oc]
    w = jnp.pad(w, ((0, 0), (0, 0), (0, OCp - OC))).astype(jnp.bfloat16)
    bias_p = jnp.pad(bias.astype(jnp.float32), (0, OCp - OC)).reshape(1, OCp)

    # ---- input: NCHW -> NHWC, zero-pad spatially (W padded up to Wpa), flatten rows ----
    x = jnp.transpose(x_nchw, (0, 2, 3, 1)).astype(jnp.float32)
    xp = jnp.pad(x, ((0, 0), (padding, padding),
                     (padding, padding + (Wpa - Wp)), (0, 0)))
    xf = xp.reshape(N, Hp * Wpa, C)

    # Flattened-rows trick: output row m = oh*Wpa + ow reads input row stride*m + kh*Wpa + kw;
    # columns ow >= OW wrap across the image edge (garbage) and are sliced off below.
    M_img = OH * Wpa
    tm_eff = min(_round_up(tm, _ALIGN), _round_up(M_img, _ALIGN))
    if N == 1 and M_img > _ALIGN:
        tm_eff = min(tm_eff, _round_up(_cdiv(M_img, 2), _ALIGN))   # >=2 tiles for megacore
    n_tiles = _cdiv(M_img, tm_eff)
    M_pad = n_tiles * tm_eff

    L = stride * (M_pad - 1) + (KH - 1) * Wpa + 1                  # rows needed after KW fold
    rows_needed = L + (KW - 1)
    if rows_needed > Hp * Wpa:
        xf = jnp.pad(xf, ((0, 0), (0, rows_needed - Hp * Wpa), (0, 0)))

    # KW fold into the contraction dim (channel axis), pre-cast to bf16.
    xkw = jnp.concatenate([xf[:, kw:kw + L, :] for kw in range(KW)],
                          axis=-1).astype(jnp.bfloat16)           # (N, L, KW*C)

    w_spec = pl.BlockSpec((KH, KWC, OCp), lambda n, j: (0, 0, 0))
    b_spec = pl.BlockSpec((1, OCp), lambda n, j: (0, 0))
    out_spec = pl.BlockSpec((None, tm_eff, OCp), lambda n, j: (n, j, 0))

    if stride == 1:
        x_in = xkw
        x_spec = pl.BlockSpec((None, L, KWC), lambda n, j: (n, 0, 0))   # resident per image
        kernel = functools.partial(
            _conv_kernel_resident,
            row_offsets=tuple(kh * Wpa for kh in range(KH)), act=act)
        img_bytes = 2 * L * KWC * 2
    else:
        # Pre-gather the strided rows per kh tap (wrapper-side strided slice), so the kernel
        # only does contiguous aligned loads on row tiles.
        xs = jnp.stack(
            [xkw[:, kh * Wpa: kh * Wpa + stride * M_pad: stride, :][:, :M_pad, :]
             for kh in range(KH)], axis=1)                              # (N, KH, M_pad, KW*C)
        x_in = xs
        x_spec = pl.BlockSpec((None, KH, tm_eff, KWC), lambda n, j: (n, 0, j, 0))
        kernel = functools.partial(_conv_kernel_gathered, act=act)
        img_bytes = 2 * KH * tm_eff * KWC * 2

    buf_bytes = (img_bytes + 2 * KH * KWC * OCp * 2 + 2 * OCp * 4
                 + 4 * tm_eff * OCp * 4)

    out_full = pl.pallas_call(
        kernel,
        out_shape=jax.ShapeDtypeStruct((N, M_pad, OCp), jnp.float32),
        grid_spec=pltpu.PrefetchScalarGridSpec(
            num_scalar_prefetch=0,
            grid=(N, n_tiles),
            in_specs=[x_spec, w_spec, b_spec],
            out_specs=out_spec),
        compiler_params=_mosaic_params(buf_bytes),
    )(x_in, w, bias_p)

    # ---- strip OC padding / wrap-around columns, back to NCHW ----------------
    out = out_full[:, :M_img, :OC].reshape(N, OH, Wpa, OC)[:, :, :OW, :]
    return jnp.transpose(out, (0, 3, 1, 2))


# ----------------------------- reference (pure JAX) --------------------------

def _reference(x_nchw, params, *, stride, padding, act, use_bn, bn_eps=1e-5):
    y = jax.lax.conv_general_dilated(
        x_nchw, params["weight"],
        window_strides=(stride, stride),
        padding=[(padding, padding), (padding, padding)],
        dimension_numbers=("NCHW", "OIHW", "NCHW"),
    )
    if use_bn:
        g = params["bn_gamma"][None, :, None, None]
        b = params["bn_beta"][None, :, None, None]
        m = params["bn_mean"][None, :, None, None]
        v = params["bn_var"][None, :, None, None]
        y = g * (y - m) / jnp.sqrt(v + bn_eps) + b
    else:
        y = y + params.get("bias", jnp.zeros((y.shape[1],)))[None, :, None, None]
    if act == "relu":
        y = jnp.maximum(y, 0.0)
    elif act == "silu":
        y = y * jax.nn.sigmoid(y)
    return y


# ----------------------------------- main ------------------------------------

if __name__ == "__main__":
    N, C, H, W = 2, 4, 16, 16
    OC, KH, KW = 8, 3, 3

    key = jax.random.PRNGKey(0)
    k_x, k_w, k_b, k_g, k_bb, k_m, k_v = jax.random.split(key, 7)

    x = jax.random.normal(k_x, (N, C, H, W), jnp.float32)
    params = {
        "weight": jax.random.normal(k_w, (OC, C, KH, KW), jnp.float32) * 0.1,
        "bias": 0.1 * jax.random.normal(k_b, (OC,), jnp.float32),
        "bn_gamma": 1.0 + 0.1 * jax.random.normal(k_g, (OC,), jnp.float32),
        "bn_beta": 0.1 * jax.random.normal(k_bb, (OC,), jnp.float32),
        "bn_mean": 0.05 * jax.random.normal(k_m, (OC,), jnp.float32),
        "bn_var": jnp.abs(jax.random.normal(k_v, (OC,), jnp.float32)) + 0.5,
    }

    # Tolerance is loosened vs the f32 XLA reference because the matmul operands are bf16.
    ATOL = RTOL = 5e-2

    # Case 1: ConvModule(4, 8, k=3, s=1, p=1, norm=BN, act=SiLU)  (conv bias absent)
    fwd1 = jax.jit(functools.partial(conv_module_forward, stride=1, padding=1,
                                     act="silu", use_bn=True))
    out1 = jax.block_until_ready(fwd1(x, params))
    ref1 = _reference(x, params, stride=1, padding=1, act="silu", use_bn=True)
    assert out1.shape == (N, OC, 16, 16), out1.shape
    assert jnp.allclose(out1, ref1, atol=ATOL, rtol=RTOL), float(jnp.max(jnp.abs(out1 - ref1)))

    # Case 2: ConvModule(4, 8, k=3, s=1, p=0, act=ReLU, bias=True, no norm)
    fwd2 = jax.jit(functools.partial(conv_module_forward, stride=1, padding=0,
                                     act="relu", use_bn=False))
    out2 = jax.block_until_ready(fwd2(x, params))
    ref2 = _reference(x, params, stride=1, padding=0, act="relu", use_bn=False)
    assert out2.shape == (N, OC, 14, 14), out2.shape
    assert jnp.allclose(out2, ref2, atol=ATOL, rtol=RTOL), float(jnp.max(jnp.abs(out2 - ref2)))

    # Case 3: ConvModule(4, 8, k=3, s=2, p=1, bias=True, no norm, no act) — strided path.
    fwd3 = jax.jit(functools.partial(conv_module_forward, stride=2, padding=1,
                                     act=None, use_bn=False))
    out3 = jax.block_until_ready(fwd3(x, params))
    ref3 = _reference(x, params, stride=2, padding=1, act=None, use_bn=False)
    assert out3.shape == (N, OC, 8, 8), out3.shape
    assert jnp.allclose(out3, ref3, atol=ATOL, rtol=RTOL), float(jnp.max(jnp.abs(out3 - ref3)))

    print("KERNEL_OK")
</pallas_src>

<mosaic_0001>
module attributes {stable_mosaic.version = 11 : i64} {
  func.func @_conv_kernel_resident(%arg0: i32, %arg1: i32, %arg2: memref<1x576x12xbf16, #tpu.memory_space<vmem>>, %arg3: memref<3x12x128xbf16, #tpu.memory_space<vmem>>, %arg4: memref<1x128xf32, #tpu.memory_space<vmem>>, %arg5: memref<1x512x128xf32, #tpu.memory_space<vmem>>) attributes {dimension_semantics = [#tpu.dimension_semantics<parallel>, #tpu.dimension_semantics<parallel>], iteration_bounds = array<i64: 2, 1>, scalar_prefetch = 0 : i64, scratch_operands = 0 : i64, tpu.core_type = #tpu.core_type<tc>, window_params = [{transform_indices = @transform_0, window_bounds = array<i64: 1, 576, 12>}, {pipeline_mode = #tpu.pipeline_mode<synchronous>, transform_indices = @transform_1, window_bounds = array<i64: 3, 12, 128>}, {pipeline_mode = #tpu.pipeline_mode<synchronous>, transform_indices = @transform_2, window_bounds = array<i64: 1, 128>}, {transform_indices = @transform_3, window_bounds = array<i64: 1, 512, 128>}]} {
    %c512_i32 = arith.constant 512 : i32
    %0 = arith.muli %arg1, %c512_i32 : i32
    %c0_i32 = arith.constant 0 : i32
    %1 = arith.addi %0, %c0_i32 : i32
    %2 = tpu.assume_multiple %1, 16 : i32
    %c0 = arith.constant 0 : index
    %3 = arith.index_cast %2 : i32 to index
    %c0_0 = arith.constant 0 : index
    %4 = vector.load %arg2[%c0, %3, %c0_0] : memref<1x576x12xbf16, #tpu.memory_space<vmem>>, vector<1x512x12xbf16>
    %5 = vector.shape_cast %4 : vector<1x512x12xbf16> to vector<512x12xbf16>
    %c0_1 = arith.constant 0 : index
    %c0_2 = arith.constant 0 : index
    %c0_3 = arith.constant 0 : index
    %6 = vector.load %arg3[%c0_1, %c0_2, %c0_3] : memref<3x12x128xbf16, #tpu.memory_space<vmem>>, vector<1x12x128xbf16>
    %7 = vector.shape_cast %6 : vector<1x12x128xbf16> to vector<12x128xbf16>
    %cst = arith.constant dense<0.000000e+00> : vector<512x128xf32>
    %8 = tpu.matmul %5, %7, %cst {dimension_numbers = #tpu.dot_dimension_numbers<[1], [0], [0], [1], [0, 0, 1, 1], [], []>} : vector<512x12xbf16>, vector<12x128xbf16>, vector<512x128xf32> -> vector<512x128xf32>
    %c32_i32 = arith.constant 32 : i32
    %9 = arith.addi %0, %c32_i32 : i32
    %10 = tpu.assume_multiple %9, 16 : i32
    %c0_4 = arith.constant 0 : index
    %11 = arith.index_cast %10 : i32 to index
    %c0_5 = arith.constant 0 : index
    %12 = vector.load %arg2[%c0_4, %11, %c0_5] : memref<1x576x12xbf16, #tpu.memory_space<vmem>>, vector<1x512x12xbf16>
    %13 = vector.shape_cast %12 : vector<1x512x12xbf16> to vector<512x12xbf16>
    %c1 = arith.constant 1 : index
    %c0_6 = arith.constant 0 : index
    %c0_7 = arith.constant 0 : index
    %14 = vector.load %arg3[%c1, %c0_6, %c0_7] : memref<3x12x128xbf16, #tpu.memory_space<vmem>>, vector<1x12x128xbf16>
    %15 = vector.shape_cast %14 : vector<1x12x128xbf16> to vector<12x128xbf16>
    %cst_8 = arith.constant dense<0.000000e+00> : vector<512x128xf32>
    %16 = tpu.matmul %13, %15, %cst_8 {dimension_numbers = #tpu.dot_dimension_numbers<[1], [0], [0], [1], [0, 0, 1, 1], [], []>} : vector<512x12xbf16>, vector<12x128xbf16>, vector<512x128xf32> -> vector<512x128xf32>
    %17 = arith.addf %8, %16 : vector<512x128xf32>
    %c64_i32 = arith.constant 64 : i32
    %18 = arith.addi %0, %c64_i32 : i32
    %19 = tpu.assume_multiple %18, 16 : i32
    %c0_9 = arith.constant 0 : index
    %20 = arith.index_cast %19 : i32 to index
    %c0_10 = arith.constant 0 : index
    %21 = vector.load %arg2[%c0_9, %20, %c0_10] : memref<1x576x12xbf16, #tpu.memory_space<vmem>>, vector<1x512x12xbf16>
    %22 = vector.shape_cast %21 : vector<1x512x12xbf16> to vector<512x12xbf16>
    %c2 = arith.constant 2 : index
    %c0_11 = arith.constant 0 : index
    %c0_12 = arith.constant 0 : index
    %23 = vector.load %arg3[%c2, %c0_11, %c0_12] : memref<3x12x128xbf16, #tpu.memory_space<vmem>>, vector<1x12x128xbf16>
    %24 = vector.shape_cast %23 : vector<1x12x128xbf16> to vector<12x128xbf16>
    %cst_13 = arith.constant dense<0.000000e+00> : vector<512x128xf32>
    %25 = tpu.matmul %22, %24, %cst_13 {dimension_numbers = #tpu.dot_dimension_numbers<[1], [0], [0], [1], [0, 0, 1, 1], [], []>} : vector<512x12xbf16>, vector<12x128xbf16>, vector<512x128xf32> -> vector<512x128xf32>
    %26 = arith.addf %17, %25 : vector<512x128xf32>
    %c0_14 = arith.constant 0 : index
    %c0_15 = arith.constant 0 : index
    %27 = vector.load %arg4[%c0_14, %c0_15] : memref<1x128xf32, #tpu.memory_space<vmem>>, vector<1x128xf32>
    %28 = vector.broadcast %27 : vector<1x128xf32> to vector<512x128xf32>
    %29 = arith.addf %26, %28 : vector<512x128xf32>
    %30 = arith.negf %29 : vector<512x128xf32>
    %31 = math.exp %30 : vector<512x128xf32>
    %cst_16 = arith.constant 1.000000e+00 : f32
    %32 = vector.broadcast %cst_16 : f32 to vector<512x128xf32>
    %33 = arith.addf %32, %31 : vector<512x128xf32>
    %34 = arith.divf %32, %33 : vector<512x128xf32>
    %35 = arith.mulf %29, %34 : vector<512x128xf32>
    %c0_17 = arith.constant 0 : index
    %c0_18 = arith.constant 0 : index
    %c0_19 = arith.constant 0 : index
    %36 = vector.load %arg5[%c0_17, %c0_18, %c0_19] : memref<1x512x128xf32, #tpu.memory_space<vmem>>, vector<1x512x128xf32>
    %37 = vector.shape_cast %36 : vector<1x512x128xf32> to vector<512x128xf32>
    %38 = vector.shape_cast %35 : vector<512x128xf32> to vector<1x512x128xf32>
    tpu.vector_store %arg5[%c0_17, %c0_18, %c0_19], %38 {strides = array<i32>} : memref<1x512x128xf32, #tpu.memory_space<vmem>>, vector<1x512x128xf32>,
    return
  }
  func.func @transform_0(%arg0: i32, %arg1: i32) -> (i32, i32, i32) {
    %c0_i32 = arith.constant 0 : i32
    %c0_i32_0 = arith.constant 0 : i32
    %c0_i32_1 = arith.constant 0 : i32
    return %arg0, %c0_i32, %c0_i32_0 : i32, i32, i32
  }
  func.func @transform_1(%arg0: i32, %arg1: i32) -> (i32, i32, i32) {
    %c0_i32 = arith.constant 0 : i32
    %c0_i32_0 = arith.constant 0 : i32
    %c0_i32_1 = arith.constant 0 : i32
    %c0_i32_2 = arith.constant 0 : i32
    return %c0_i32, %c0_i32_0, %c0_i32_1 : i32, i32, i32
  }
  func.func @transform_2(%arg0: i32, %arg1: i32) -> (i32, i32) {
    %c0_i32 = arith.constant 0 : i32
    %c0_i32_0 = arith.constant 0 : i32
    %c0_i32_1 = arith.constant 0 : i32
    return %c0_i32, %c0_i32_0 : i32, i32
  }
  func.func @transform_3(%arg0: i32, %arg1: i32) -> (i32, i32, i32) {
    %c0_i32 = arith.constant 0 : i32
    %c0_i32_0 = arith.constant 0 : i32
    return %arg0, %arg1, %c0_i32 : i32, i32, i32
  }
}

</mosaic_0001>

<bundles_post_ra>
// kernel: conv_module_forward.1
= control target key start
LH: loop header
LB: loop body
LE: loop exit
PB: predicated region body
PF: predicated region fallthrough
CT: control target
= control target key end

     0   :  { %s4064_s12 = smov 0   ;;  %s4066_s13 = smov 0   ;;  %s4779_s0 = inlined_call_operand.vmem [shape: bf16[2,576,12], index: 0, kind: input, shape index: {}]   ;;  %s4780_s1 = inlined_call_operand.vmem [shape: bf16[3,12,128], index: 1, kind: input, shape index: {}]   ;;  %s4781_s2 = inlined_call_operand.vmem [shape: f32[1,128], index: 2, kind: input, shape index: {}]   ;;  %s4782_s3 = inlined_call_operand.vmem [shape: f32[2,512,128], index: 3, kind: output, shape index: {}]  }
   0x1   :  { %s4068_s14 = smov 0  }
   0x2 LB: > { %s25_s15 = sadd.s32 1, %s4038_s13  ;;  %p2809_p0 = scmp.ge.s32.totalorder %s4042_s14, 1  ;;  %s4042_s14 = sphi %s4068_s14, %s13_s14   ;;  %s4038_s13 = sphi %s4066_s13, %s4784_s13   ;;  %s4034_s12 = sphi %s4064_s12, %s4783_s12  }
   0x3   : > { %p27_p1 = scmp.ge.s32.totalorder %s25_s15, 2  ;;  %p151_p2 = scmp.lt.s32.totalorder %s4042_s14, 3 }
   0x5   : > { %s4786_s15 = smov (%p27_p1, %s25_s15), 0  ;;  %p152_p3 = pnand %p2809_p0, %p151_p2 }
   0x6   : > { %v3664_v0 = vld [vmem:[%s4780_s1 + $0x8] sm:$0x3f] (!%p152_p3)   ;;  %vm600_vm0 = vcmask (!%p152_p3), 1045504   ;;  %p179_p4 = scmp.lt.s32.totalorder (!%p152_p3), %s4034_s12, 1  ;;  %v3665_v1 = vld [vmem:[%s4780_s1] sm:$0x3f] (!%p152_p3)  }
   0x7   : > { %155 = sbr.rel (%p152_p3) target bundleno = 461 (0x1cd), region = 32  ;;  %3635 = vmatprep.subr.msk.bf16.mxu1 (!%p152_p3), %vm600_vm0, %v3664_v0  ;;  %v602_v2 = vsel (!%p152_p3), %vm600_vm0, %v3664_v0, 0  ;;  %v3668_v3 = vld [vmem:[%s4780_s1 + $0x10] sm:$0x3f] (!%p152_p3)   ;;  %3636 = vmatprep.subr.msk.bf16.mxu0 (!%p152_p3), %vm600_vm0, %v3665_v1  ;;  %v1155_v4 = vsel (!%p152_p3), %vm600_vm0, %v3665_v1, 0  ;;  %vm503_vm1 = vcmask (!%p152_p3), 97280  }
   0x8   : > { %3308 = vmatpush3.bf16.msra.mxu1 (!%p152_p3), %v602_v2  ;;  %3374 = vmatpush3.bf16.msra.mxu0 (!%p152_p3), %v1155_v4  ;;  %v1780_v9 = vsel (!%p152_p3), %vm600_vm0, %v3668_v3, 0 }
   0x9   : > { %3637 = vmatprep.subr.msk.bf16.mxu1 (!%p152_p3), %vm600_vm0, %v3665_v1  ;;  %3638 = vmatprep.subr.msk.bf16.mxu0 (!%p152_p3), %vm600_vm0, %v3668_v3 }
   0xe   : > { %s4788_s12 = smov (!%p179_p4, %s4034_s12), 1 }
   0xf   : > { %s3639_s22 = smul.u32 288, %s4788_s12  ;;  %s3207_s28 = sshll.u32 %s4788_s12, 9 }
  0x10   : > { %s4421_s4 = scalar_lea.vmem %s4782_s3, %s3207_s28 }
  0x11   : > { %s4103_s25 = scalar_lea.vmem %s4779_s0, %s3639_s22 }
  0x12   : > { %v3666_v5 = vld [vmem:[%s4103_s25 + $0x10] sm:$0xff]   ;;  %v3667_v6 = vld [vmem:[%s4103_s25] sm:$0xff]   ;;  %v3669_v7 = vld [vmem:[%s4103_s25 + $0x18] sm:$0xff]  }
  0x13   : > { %3309 = vmatprep.mubr.msk.bf16.mxu1 %vm503_vm1, %v3666_v5  ;;  %3375 = vmatprep.mubr.msk.bf16.mxu0 %vm503_vm1, %v3667_v6  ;;  %v3670_v8 = vld [vmem:[%s4103_s25 + $0x8] sm:$0xff]   ;;  %v3671_v10 = vld [vmem:[%s4103_s25 + $0x20] sm:$0xff]   ;;  %v3672_v11 = vld [vmem:[%s4103_s25 + $0x10] sm:$0xff]  }
  0x14   : > { %3310 = vmatmul.mubr.msk.bf16.vlgmr.msra.gmra.mrb[0].mxu1 %vm503_vm1, %v3669_v7  ;;  %3376 = vmatmul.mubr.msk.bf16.vlgmr.msra.gmra.mrb[0].mxu0 %vm503_vm1, %v3670_v8  ;;  %v3673_v12 = vld [vmem:[%s4103_s25 + $0x28] sm:$0xff]   ;;  %v3674_v13 = vld [vmem:[%s4103_s25 + $0x18] sm:$0xff]   ;;  %v3675_v14 = vld [vmem:[%s4103_s25 + $0x30] sm:$0xff]  }
  0x15   : > { %3506 = vmatpush3.bf16.msra.mxu1 %v1155_v4  ;;  %3440 = vmatpush3.bf16.msra.mxu0 %v1780_v9  ;;  %v3676_v15 = vld [vmem:[%s4103_s25 + $0x20] sm:$0xff]   ;;  %v3677_v16 = vld [vmem:[%s4103_s25 + $0x38] sm:$0xff]   ;;  %v3678_v17 = vld [vmem:[%s4103_s25 + $0x28] sm:$0xff]  }
  0x16   : > { %3313 = vmatprep.mubr.msk.bf16.mxu1 %vm503_vm1, %v3671_v10  ;;  %3379 = vmatprep.mubr.msk.bf16.mxu0 %vm503_vm1, %v3672_v11  ;;  %v3679_v18 = vld [vmem:[%s4103_s25 + $0x40] sm:$0xff]   ;;  %v3680_v19 = vld [vmem:[%s4103_s25 + $0x30] sm:$0xff]   ;;  %v3681_v20 = vld [vmem:[%s4103_s25 + $0x48] sm:$0xff]  }
  0x17   : > { %v3682_v21 = vld [vmem:[%s4103_s25 + $0x38] sm:$0xff]   ;;  %v3683_v22 = vld [vmem:[%s4103_s25 + $0x50] sm:$0xff]   ;;  %v3684_v23 = vld [vmem:[%s4103_s25 + $0x40] sm:$0xff]  }
  0x18   : > { %v3685_v24 = vld [vmem:[%s4103_s25 + $0x58] sm:$0xff]   ;;  %v3686_v25 = vld [vmem:[%s4103_s25 + $0x48] sm:$0xff]   ;;  %v3687_v26 = vld [vmem:[%s4103_s25 + $0x60] sm:$0xff]  }
  0x19   : > { %v3688_v27 = vld [vmem:[%s4103_s25 + $0x50] sm:$0xff]   ;;  %v3689_v28 = vld [vmem:[%s4103_s25 + $0x68] sm:$0xff]   ;;  %v3690_v29 = vld [vmem:[%s4103_s25 + $0x58] sm:$0xff]  }
  0x1a   : > { %v3691_v30 = vld [vmem:[%s4103_s25 + $0x70] sm:$0xff]   ;;  %v3692_v31 = vld [vmem:[%s4103_s25 + $0x60] sm:$0xff]   ;;  %v3693_v32 = vld [vmem:[%s4103_s25 + $0x78] sm:$0xff]  }
  0x1b   : > { %v3694_v33 = vld [vmem:[%s4103_s25 + $0x68] sm:$0xff]   ;;  %v3695_v34 = vld [vmem:[%s4103_s25 + $0x80] sm:$0xff]   ;;  %v3696_v35 = vld [vmem:[%s4103_s25 + $0x70] sm:$0xff]  }
  0x1c   : > { %3314 = vmatmul.mubr.msk.bf16.gmra.mrb[4].mxu1 %vm503_vm1, %v3673_v12  ;;  %3380 = vmatmul.mubr.msk.bf16.gmra.mrb[4].mxu0 %vm503_vm1, %v3674_v13  ;;  %v3697_v36 = vld [vmem:[%s4103_s25 + $0x88] sm:$0xff]   ;;  %v3698_v37 = vld [vmem:[%s4103_s25 + $0x78] sm:$0xff]   ;;  %v3699_v38 = vld [vmem:[%s4103_s25 + $0x90] sm:$0xff]  }
  0x1d   : > { %3317 = vmatprep.mubr.msk.bf16.mxu1 %vm503_vm1, %v3675_v14  ;;  %3383 = vmatprep.mubr.msk.bf16.mxu0 %vm503_vm1, %v3676_v15  ;;  %v3700_v39 = vld [vmem:[%s4103_s25 + $0x20] sm:$0xff]   ;;  %v3701_v40 = vld [vmem:[%s4103_s25 + $0x98] sm:$0xff]   ;;  %v3702_v41 = vld [vmem:[%s4103_s25 + $0x28] sm:$0xff]  }
  0x1e   : > { %v3703_v42 = vld [vmem:[%s4103_s25 + $0xa0] sm:$0xff]   ;;  %v3704_v43 = vld [vmem:[%s4103_s25 + $0x30] sm:$0xff]   ;;  %v3705_v44 = vld [vmem:[%s4103_s25 + $0xa8] sm:$0xff]  }
  0x1f   : > { %v3706_v45 = vld [vmem:[%s4103_s25 + $0x38] sm:$0xff]   ;;  %v3707_v46 = vld [vmem:[%s4103_s25 + $0xb0] sm:$0xff]   ;;  %v3708_v47 = vld [vmem:[%s4103_s25 + $0x40] sm:$0xff]  }
  0x20   : > { %v3709_v48 = vld [vmem:[%s4103_s25 + $0xb8] sm:$0xff]   ;;  %v3710_v49 = vld [vmem:[%s4103_s25 + $0x48] sm:$0xff]   ;;  %v3711_v50 = vld [vmem:[%s4103_s25 + $0xc0] sm:$0xff]  }
  0x21   : > { %v3712_v51 = vld [vmem:[%s4103_s25 + $0x50] sm:$0xff]   ;;  %v3713_v52 = vld [vmem:[%s4103_s25 + $0xc8] sm:$0xff]   ;;  %v3714_v53 = vld [vmem:[%s4103_s25 + $0x58] sm:$0xff]  }
  0x22   : > { %v3715_v54 = vld [vmem:[%s4103_s25 + $0xd0] sm:$0xff]   ;;  %v3716_v55 = vld [vmem:[%s4103_s25 + $0x60] sm:$0xff]   ;;  %v3717_v56 = vld [vmem:[%s4103_s25 + $0xd8] sm:$0xff]  }
  0x23   : > { %v3718_v57 = vld [vmem:[%s4103_s25 + $0x68] sm:$0xff]   ;;  %v3719_v58 = vld [vmem:[%s4103_s25 + $0xe0] sm:$0xff]   ;;  %v3720_v59 = vld [vmem:[%s4103_s25 + $0x70] sm:$0xff]  }
  0x24   : > { %3318 = vmatmul.mubr.msk.bf16.gmra.mrb[8].mxu1 %vm503_vm1, %v3677_v16  ;;  %3384 = vmatmul.mubr.msk.bf16.gmra.mrb[8].mxu0 %vm503_vm1, %v3678_v17  ;;  %v3721_v60 = vld [vmem:[%s4103_s25 + $0xe8] sm:$0xff]   ;;  %v3722_v61 = vld [vmem:[%s4103_s25 + $0x78] sm:$0xff]   ;;  %v3723_v62 = vld [vmem:[%s4103_s25 + $0xf0] sm:$0xff]  }
  0x25   : > { %3321 = vmatprep.mubr.msk.bf16.mxu1 %vm503_vm1, %v3679_v18  ;;  %3387 = vmatprep.mubr.msk.bf16.mxu0 %vm503_vm1, %v3680_v19  ;;  %v3724_v63 = vld [vmem:[%s4103_s25 + $0x80] sm:$0xff]   ;;  %v3725_v0 = vld [vmem:[%s4103_s25 + $0xf8] sm:$0xff]   ;;  %v3726_v1 = vld [vmem:[%s4103_s25 + $0x88] sm:$0xff]  }
  0x26   : > { %v3727_v2 = vld [vmem:[%s4103_s25 + $0x100] sm:$0xff]   ;;  %v3728_v3 = vld [vmem:[%s4103_s25 + $0x90] sm:$0xff]   ;;  %v3729_v4 = vld [vmem:[%s4103_s25 + $0x108] sm:$0xff]  }
  0x27   : > { %v3730_v5 = vld [vmem:[%s4103_s25 + $0x98] sm:$0xff]   ;;  %v3731_v6 = vld [vmem:[%s4103_s25 + $0x80] sm:$0xff]   ;;  %v3733_v8 = vld [vmem:[%s4103_s25 + $0x88] sm:$0xff]  }
  0x28   : > { %v3732_v7 = vld [vmem:[%s4103_s25 + $0xa0] sm:$0xff]   ;;  %v3734_v9 = vld [vmem:[%s4103_s25 + $0xa8] sm:$0xff]   ;;  %v3735_v10 = vld [vmem:[%s4103_s25 + $0x90] sm:$0xff]  }
  0x29   : > { %v3736_v11 = vld [vmem:[%s4103_s25 + $0xb0] sm:$0xff]   ;;  %v3737_v12 = vld [vmem:[%s4103_s25 + $0x98] sm:$0xff]   ;;  %v3739_v14 = vld [vmem:[%s4103_s25 + $0xa0] sm:$0xff]  }
  0x2a   : > { %v3738_v13 = vld [vmem:[%s4103_s25 + $0xb8] sm:$0xff]   ;;  %v3740_v15 = vld [vmem:[%s4103_s25 + $0xc0] sm:$0xff]   ;;  %v3741_v16 = vld [vmem:[%s4103_s25 + $0xa8] sm:$0xff]  }
  0x2b   : > { %v3742_v17 = vld [vmem:[%s4103_s25 + $0xc8] sm:$0xff]   ;;  %v3743_v18 = vld [vmem:[%s4103_s25 + $0xb0] sm:$0xff]  }
  0x2c   : > { %3322 = vmatmul.mubr.msk.bf16.gmra.mrb[12].mxu1 %vm503_vm1, %v3681_v20  ;;  %3388 = vmatmul.mubr.msk.bf16.gmra.mrb[12].mxu0 %vm503_vm1, %v3682_v21  ;;  %v3744_v19 = vld [vmem:[%s4103_s25 + $0xd0] sm:$0xff]   ;;  %v3745_v20 = vld [vmem:[%s4103_s25 + $0xb8] sm:$0xff]  }
  0x2d   : > { %3325 = vmatprep.mubr.msk.bf16.mxu1 %vm503_vm1, %v3683_v22  ;;  %3391 = vmatprep.mubr.msk.bf16.mxu0 %vm503_vm1, %v3684_v23  ;;  %v3746_v21 = vld [vmem:[%s4103_s25 + $0xd8] sm:$0xff]   ;;  %v3747_v22 = vld [vmem:[%s4103_s25 + $0xc0] sm:$0xff]  }
  0x2e   : > { %v3748_v23 = vld [vmem:[%s4103_s25 + $0xe0] sm:$0xff]  }
  0x34   : > { %3326 = vmatmul.mubr.msk.bf16.gmra.mrb[16].mxu1 %vm503_vm1, %v3685_v24  ;;  %3392 = vmatmul.mubr.msk.bf16.gmra.mrb[16].mxu0 %vm503_vm1, %v3686_v25  ;;  %v3749_v24 = vld [vmem:[%s4103_s25 + $0xc8] sm:$0xff]  }
  0x35   : > { %3329 = vmatprep.mubr.msk.bf16.mxu1 %vm503_vm1, %v3687_v26  ;;  %3395 = vmatprep.mubr.msk.bf16.mxu0 %vm503_vm1, %v3688_v27  ;;  %v3750_v25 = vld [vmem:[%s4103_s25 + $0xe8] sm:$0xff]   ;;  %v3751_v26 = vld [vmem:[%s4103_s25 + $0xd0] sm:$0xff]  }
  0x36   : > { %v3752_v27 = vld [vmem:[%s4103_s25 + $0xf0] sm:$0xff]  }
  0x3c   : > { %3330 = vmatmul.mubr.msk.bf16.gmra.mrb[20].mxu1 %vm503_vm1, %v3689_v28  ;;  %3396 = vmatmul.mubr.msk.bf16.gmra.mrb[20].mxu0 %vm503_vm1, %v3690_v29  ;;  %v3753_v28 = vld [vmem:[%s4103_s25 + $0xd8] sm:$0xff]  }
  0x3d   : > { %3333 = vmatprep.mubr.msk.bf16.mxu1 %vm503_vm1, %v3691_v30  ;;  %3399 = vmatprep.mubr.msk.bf16.mxu0 %vm503_vm1, %v3692_v31  ;;  %v3754_v29 = vld [vmem:[%s4103_s25 + $0xf8] sm:$0xff]   ;;  %v3755_v30 = vld [vmem:[%s4103_s25 + $0xe0] sm:$0xff]  }
  0x3e   : > { %v3756_v31 = vld [vmem:[%s4103_s25 + $0x100] sm:$0xff]  }
  0x44   : > { %3334 = vmatmul.mubr.msk.bf16.gmra.mrb[24].mxu1 %vm503_vm1, %v3693_v32  ;;  %3400 = vmatmul.mubr.msk.bf16.gmra.mrb[24].mxu0 %vm503_vm1, %v3694_v33  ;;  %v3757_v32 = vld [vmem:[%s4103_s25 + $0xe8] sm:$0xff]  }
  0x45   : > { %3337 = vmatprep.mubr.msk.bf16.mxu1 %vm503_vm1, %v3695_v34  ;;  %3403 = vmatprep.mubr.msk.bf16.mxu0 %vm503_vm1, %v3696_v35  ;;  %v3758_v33 = vld [vmem:[%s4103_s25 + $0x108] sm:$0xff]   ;;  %v3759_v34 = vld [vmem:[%s4103_s25 + $0xf0] sm:$0xff]  }
  0x46   : > { %v3760_v35 = vld [vmem:[%s4103_s25 + $0x110] sm:$0xff]  }
  0x4c   : > { %3338 = vmatmul.mubr.msk.bf16.gmra.mrb[28].mxu1 %vm503_vm1, %v3697_v36  ;;  %3404 = vmatmul.mubr.msk.bf16.gmra.mrb[28].mxu0 %vm503_vm1, %v3698_v37  ;;  %v3761_v36 = vld [vmem:[%s4103_s25 + $0xf8] sm:$0xff]  }
  0x4d   : > { %3341 = vmatprep.mubr.msk.bf16.mxu1 %vm503_vm1, %v3699_v38  ;;  %3441 = vmatprep.mubr.msk.bf16.mxu0 %vm503_vm1, %v3700_v39  ;;  %v3762_v37 = vld [vmem:[%s4103_s25 + $0x118] sm:$0xff]  }
  0x54   : > { %3342 = vmatmul.mubr.msk.bf16.gmra.mrb[32].mxu1 %vm503_vm1, %v3701_v40  ;;  %3442 = vmatmul.mubr.msk.bf16.vlgmr.msra.gmra.mrb[0].mxu0 %vm503_vm1, %v3702_v41 }
  0x55   : > { %3345 = vmatprep.mubr.msk.bf16.mxu1 %vm503_vm1, %v3703_v42  ;;  %3445 = vmatprep.mubr.msk.bf16.mxu0 %vm503_vm1, %v3704_v43 }
  0x5c   : > { %3346 = vmatmul.mubr.msk.bf16.gmra.mrb[36].mxu1 %vm503_vm1, %v3705_v44  ;;  %3446 = vmatmul.mubr.msk.bf16.gmra.mrb[4].mxu0 %vm503_vm1, %v3706_v45 }
  0x5d   : > { %3349 = vmatprep.mubr.msk.bf16.mxu1 %vm503_vm1, %v3707_v46  ;;  %3449 = vmatprep.mubr.msk.bf16.mxu0 %vm503_vm1, %v3708_v47 }
  0x64   : > { %3350 = vmatmul.mubr.msk.bf16.gmra.mrb[40].mxu1 %vm503_vm1, %v3709_v48  ;;  %3450 = vmatmul.mubr.msk.bf16.gmra.mrb[8].mxu0 %vm503_vm1, %v3710_v49 }
  0x65   : > { %3353 = vmatprep.mubr.msk.bf16.mxu1 %vm503_vm1, %v3711_v50  ;;  %3453 = vmatprep.mubr.msk.bf16.mxu0 %vm503_vm1, %v3712_v51 }
  0x6c   : > { %3354 = vmatmul.mubr.msk.bf16.gmra.mrb[44].mxu1 %vm503_vm1, %v3713_v52  ;;  %3454 = vmatmul.mubr.msk.bf16.gmra.mrb[12].mxu0 %vm503_vm1, %v3714_v53 }
  0x6d   : > { %3357 = vmatprep.mubr.msk.bf16.mxu1 %vm503_vm1, %v3715_v54  ;;  %3457 = vmatprep.mubr.msk.bf16.mxu0 %vm503_vm1, %v3716_v55 }
  0x74   : > { %3358 = vmatmul.mubr.msk.bf16.gmra.mrb[48].mxu1 %vm503_vm1, %v3717_v56  ;;  %3458 = vmatmul.mubr.msk.bf16.gmra.mrb[16].mxu0 %vm503_vm1, %v3718_v57 }
  0x75   : > { %3361 = vmatprep.mubr.msk.bf16.mxu1 %vm503_vm1, %v3719_v58  ;;  %3461 = vmatprep.mubr.msk.bf16.mxu0 %vm503_vm1, %v3720_v59 }
  0x7c   : > { %3362 = vmatmul.mubr.msk.bf16.gmra.mrb[52].mxu1 %vm503_vm1, %v3721_v60  ;;  %3462 = vmatmul.mubr.msk.bf16.gmra.mrb[20].mxu0 %vm503_vm1, %v3722_v61 }
  0x7d   : > { %3365 = vmatprep.mubr.msk.bf16.mxu1 %vm503_vm1, %v3723_v62  ;;  %3465 = vmatprep.mubr.msk.bf16.mxu0 %vm503_vm1, %v3724_v63 }
  0x84   : > { %3366 = vmatmul.mubr.msk.bf16.gmra.mrb[56].mxu1 %vm503_vm1, %v3725_v0  ;;  %3466 = vmatmul.mubr.msk.bf16.gmra.mrb[24].mxu0 %vm503_vm1, %v3726_v1 }
  0x85   : > { %3369 = vmatprep.mubr.msk.bf16.mxu1 %vm503_vm1, %v3727_v2  ;;  %3469 = vmatprep.mubr.msk.bf16.mxu0 %vm503_vm1, %v3728_v3 }
  0x8c   : > { %3370 = vmatmul.mubr.msk.bf16.gmra.mrb[60].mxu1 %vm503_vm1, %v3729_v4  ;;  %3470 = vmatmul.mubr.msk.bf16.gmra.mrb[28].mxu0 %vm503_vm1, %v3730_v5 }
  0x8d   : > { %3407 = vmatprep.mubr.msk.bf16.mxu1 %vm503_vm1, %v3731_v6  ;;  %3473 = vmatprep.mubr.msk.bf16.mxu0 %vm503_vm1, %v3732_v7  ;;  %v4349_v7 = vld [vmem:[%s4781_s2] ss:$0 sm:$0xff] }
  0x94   : > { %3408 = vmatmul.mubr.msk.bf16.vlgmr.msra.gmra.mrb[32].mxu1 %vm503_vm1, %v3733_v8  ;;  %3474 = vmatmul.mubr.msk.bf16.gmra.mrb[32].mxu0 %vm503_vm1, %v3734_v9 }
  0x95   : > { %3411 = vmatprep.mubr.msk.bf16.mxu1 %vm503_vm1, %v3735_v10  ;;  %3477 = vmatprep.mubr.msk.bf16.mxu0 %vm503_vm1, %v3736_v11 }
  0x9c   : > { %3412 = vmatmul.mubr.msk.bf16.gmra.mrb[36].mxu1 %vm503_vm1, %v3737_v12  ;;  %3478 = vmatmul.mubr.msk.bf16.gmra.mrb[36].mxu0 %vm503_vm1, %v3738_v13 }
  0x9d   : > { %3415 = vmatprep.mubr.msk.bf16.mxu1 %vm503_vm1, %v3739_v14  ;;  %3481 = vmatprep.mubr.msk.bf16.mxu0 %vm503_vm1, %v3740_v15 }
  0xa4   : > { %3416 = vmatmul.mubr.msk.bf16.gmra.mrb[40].mxu1 %vm503_vm1, %v3741_v16  ;;  %3482 = vmatmul.mubr.msk.bf16.gmra.mrb[40].mxu0 %vm503_vm1, %v3742_v17 }
  0xa5   : > { %3419 = vmatprep.mubr.msk.bf16.mxu1 %vm503_vm1, %v3743_v18  ;;  %3485 = vmatprep.mubr.msk.bf16.mxu0 %vm503_vm1, %v3744_v19 }
  0xac   : > { %3420 = vmatmul.mubr.msk.bf16.gmra.mrb[44].mxu1 %vm503_vm1, %v3745_v20  ;;  %3486 = vmatmul.mubr.msk.bf16.gmra.mrb[44].mxu0 %vm503_vm1, %v3746_v21 }
  0xad   : > { %3423 = vmatprep.mubr.msk.bf16.mxu1 %vm503_vm1, %v3747_v22  ;;  %3489 = vmatprep.mubr.msk.bf16.mxu0 %vm503_vm1, %v3748_v23 }
  0xb4   : > { %3424 = vmatmul.mubr.msk.bf16.gmra.mrb[48].mxu1 %vm503_vm1, %v3749_v24  ;;  %3490 = vmatmul.mubr.msk.bf16.gmra.mrb[48].mxu0 %vm503_vm1, %v3750_v25 }
  0xb5   : > { %3427 = vmatprep.mubr.msk.bf16.mxu1 %vm503_vm1, %v3751_v26  ;;  %3493 = vmatprep.mubr.msk.bf16.mxu0 %vm503_vm1, %v3752_v27 }
  0xbc   : > { %3428 = vmatmul.mubr.msk.bf16.gmra.mrb[52].mxu1 %vm503_vm1, %v3753_v28  ;;  %3494 = vmatmul.mubr.msk.bf16.gmra.mrb[52].mxu0 %vm503_vm1, %v3754_v29 }
  0xbd   : > { %3431 = vmatprep.mubr.msk.bf16.mxu1 %vm503_vm1, %v3755_v30  ;;  %3497 = vmatprep.mubr.msk.bf16.mxu0 %vm503_vm1, %v3756_v31 }
  0xc4   : > { %3432 = vmatmul.mubr.msk.bf16.gmra.mrb[56].mxu1 %vm503_vm1, %v3757_v32  ;;  %3498 = vmatmul.mubr.msk.bf16.gmra.mrb[56].mxu0 %vm503_vm1, %v3758_v33 }
  0xc5   : > { %3435 = vmatprep.mubr.msk.bf16.mxu1 %vm503_vm1, %v3759_v34  ;;  %3501 = vmatprep.mubr.msk.bf16.mxu0 %vm503_vm1, %v3760_v35 }
  0xcc   : > { %3436 = vmatmul.mubr.msk.bf16.gmra.mrb[60].mxu1 %vm503_vm1, %v3761_v36  ;;  %3502 = vmatmul.mubr.msk.bf16.gmra.mrb[60].mxu0 %vm503_vm1, %v3762_v37 }
  0xe7   : > { %v3311_v38 = vpop.f32.mrb[0].mxu1 }
  0xe8   : > { %v638_v39 = vpop.f32.mrb[1].mxu1 }
  0xe9   : > { %v3312_v40 = vpop.f32.mrb[2].mxu1 }
  0xea   : > { %v641_v41 = vpop.f32.mrb[3].mxu1 }
  0xef   : > { %v3315_v42 = vpop.f32.mrb[4].mxu1 }
  0xf0   : > { %v654_v43 = vpop.f32.mrb[5].mxu1 }
  0xf1   : > { %v3316_v44 = vpop.f32.mrb[6].mxu1 }
  0xf2   : > { %v657_v45 = vpop.f32.mrb[7].mxu1 }
  0xf7   : > { %v4298_v46 = vpop.f32.mrb[8].mxu1 }
  0xf8   : > { %v4300_v47 = vpop.f32.mrb[9].mxu1 }
  0xf9   : > { %v4302_v48 = vpop.f32.mrb[10].mxu1 }
  0xfa   : > { %v4304_v49 = vpop.f32.mrb[11].mxu1 }
  0xff   : > { %v4306_v50 = vpop.f32.mrb[12].mxu1 }
 0x100   : > { %v4308_v51 = vpop.f32.mrb[13].mxu1 }
 0x101   : > { %v4310_v52 = vpop.f32.mrb[14].mxu1 }
 0x102   : > { %v4312_v53 = vpop.f32.mrb[15].mxu1 }
 0x107   : > { %v4314_v54 = vpop.f32.mrb[16].mxu1 }
 0x108   : > { %v4316_v55 = vpop.f32.mrb[17].mxu1 }
 0x109   : > { %v4318_v56 = vpop.f32.mrb[18].mxu1 }
 0x10a   : > { %v4320_v57 = vpop.f32.mrb[19].mxu1 }
 0x10f   : > { %v4322_v58 = vpop.f32.mrb[20].mxu1 }
 0x110   : > { %v4324_v59 = vpop.f32.mrb[21].mxu1 }
 0x111   : > { %v4326_v60 = vpop.f32.mrb[22].mxu1 }
 0x112   : > { %v4328_v61 = vpop.f32.mrb[23].mxu1 }
 0x117   : > { %v4330_v62 = vpop.f32.mrb[24].mxu1 }
 0x118   : > { %v4332_v63 = vpop.f32.mrb[25].mxu1 }
 0x119   : > { %v4334_v0 = vpop.f32.mrb[26].mxu1 }
 0x11a   : > { %v4336_v1 = vpop.f32.mrb[27].mxu1 }
 0x11f   : > { %v4338_v2 = vpop.f32.mrb[28].mxu1 }
 0x120   : > { %v4340_v3 = vpop.f32.mrb[29].mxu1 }
 0x121   : > { %v4342_v4 = vpop.f32.mrb[30].mxu1 }
 0x122   : > { %v4344_v5 = vpop.f32.mrb[31].mxu1 }
 0x127   : > { %v3443_v6 = vpop.f32.mrb[0].mxu0 }
 0x128   : > { %v3507_v8 = vadd.f32 %v3443_v6, %v3311_v38  ;;  %v1816_v9 = vpop.f32.mrb[1].mxu0 }
 0x129   : > { %v3508_v10 = vadd.f32 %v1816_v9, %v638_v39  ;;  %v3444_v11 = vpop.f32.mrb[2].mxu0 }
 0x12a   : > { %v4352_v12 = vadd.f32 %v3507_v8, %v4349_v7  ;;  %v3509_v13 = vadd.f32 %v3444_v11, %v3312_v40  ;;  %v1819_v14 = vpop.f32.mrb[3].mxu0 }
 0x12b   : > { %v4355_v15 = vadd.f32 %v3508_v10, %v4349_v7  ;;  %v3510_v16 = vadd.f32 %v1819_v14, %v641_v41 }
 0x12c   : > { %v3143_v17 = vmul.f32 -1.442695, %v4352_v12  ;;  %v4359_v18 = vadd.f32 %v3509_v13, %v4349_v7 }
 0x12d   : > { %v3141_v19 = vmul.f32 -1.442695, %v4355_v15  ;;  %v4363_v20 = vadd.f32 %v3510_v16, %v4349_v7 }
 0x12e   : > { %3763 = vpow2.f32 %v3143_v17  ;;  %v3144_v21 = vmul.f32 -1.442695, %v4359_v18 }
 0x12f   : > { %3765 = vpow2.f32 %v3141_v19  ;;  %v3142_v22 = vmul.f32 -1.442695, %v4363_v20  ;;  %v3447_v23 = vpop.f32.mrb[4].mxu0 }
 0x130   : > { %3767 = vpow2.f32 %v3144_v21  ;;  %v3511_v24 = vadd.f32 %v3447_v23, %v3315_v42  ;;  %v1832_v25 = vpop.f32.mrb[5].mxu0 }
 0x131   : > { %3769 = vpow2.f32 %v3142_v22  ;;  %v3512_v26 = vadd.f32 %v1832_v25, %v654_v43  ;;  %v3448_v27 = vpop.f32.mrb[6].mxu0 }
 0x132   : > { %v4368_v28 = vadd.f32 %v3511_v24, %v4349_v7  ;;  %v3513_v29 = vadd.f32 %v3448_v27, %v3316_v44  ;;  %v1835_v30 = vpop.f32.mrb[7].mxu0 }
 0x133   : > { %v4371_v31 = vadd.f32 %v3512_v26, %v4349_v7  ;;  %v3514_v32 = vadd.f32 %v1835_v30, %v657_v45 }
 0x134   : > { %v3147_v33 = vmul.f32 -1.442695, %v4368_v28  ;;  %v4375_v34 = vadd.f32 %v3513_v29, %v4349_v7 }
 0x135   : > { %v3145_v35 = vmul.f32 -1.442695, %v4371_v31  ;;  %v4379_v36 = vadd.f32 %v3514_v32, %v4349_v7 }
 0x136   : > { %3771 = vpow2.f32 %v3147_v33  ;;  %v3148_v37 = vmul.f32 -1.442695, %v4375_v34 }
 0x137   : > { %3773 = vpow2.f32 %v3145_v35  ;;  %v3146_v38 = vmul.f32 -1.442695, %v4379_v36  ;;  %v3451_v39 = vpop.f32.mrb[8].mxu0 }
 0x138   : > { %v3764_v40 = vpop.eup %3763  ;;  %3775 = vpow2.f32 %v3148_v37  ;;  %v3515_v41 = vadd.f32 %v3451_v39, %v4298_v46  ;;  %v1848_v42 = vpop.f32.mrb[9].mxu0 }
 0x139   : > { %v3766_v43 = vpop.eup %3765  ;;  %v2400_v44 = vadd.f32 1.0, %v3764_v40  ;;  %3777 = vpow2.f32 %v3146_v38  ;;  %v3516_v45 = vadd.f32 %v1848_v42, %v4300_v47  ;;  %v3452_v6 = vpop.f32.mrb[10].mxu0 }
 0x13a   : > { %v3768_v8 = vpop.eup %3767  ;;  %v2398_v9 = vadd.f32 1.0, %v3766_v43  ;;  %v4386_v10 = vadd.f32 %v3515_v41, %v4349_v7  ;;  %v3517_v11 = vadd.f32 %v3452_v6, %v4302_v48  ;;  %v1851_v13 = vpop.f32.mrb[11].mxu0 }
 0x13b   : > { %v3770_v14 = vpop.eup %3769  ;;  %3779 = vrcp.f32 %v2400_v44  ;;  %v2401_v16 = vadd.f32 1.0, %v3768_v8  ;;  %v4390_v46 = vadd.f32 %v3516_v45, %v4349_v7  ;;  %v3518_v17 = vadd.f32 %v1851_v13, %v4304_v49 }
 0x13c   : > { %3781 = vrcp.f32 %v2398_v9  ;;  %v2399_v19 = vadd.f32 1.0, %v3770_v14  ;;  %v3151_v47 = vmul.f32 -1.442695, %v4386_v10  ;;  %v4395_v21 = vadd.f32 %v3517_v11, %v4349_v7 }
 0x13d   : > { %3783 = vrcp.f32 %v2401_v16  ;;  %v3149_v22 = vmul.f32 -1.442695, %v4390_v46  ;;  %v4399_v48 = vadd.f32 %v3518_v17, %v4349_v7 }
 0x13e   : > { %3785 = vrcp.f32 %v2399_v19  ;;  %v3152_v23 = vmul.f32 -1.442695, %v4395_v21 }
 0x13f   : > { %3787 = vpow2.f32 %v3151_v47  ;;  %v3150_v49 = vmul.f32 -1.442695, %v4399_v48  ;;  %v3455_v24 = vpop.f32.mrb[12].mxu0 }
 0x140   : > { %v3772_v25 = vpop.eup %3771  ;;  %3789 = vpow2.f32 %v3149_v22  ;;  %v3519_v26 = vadd.f32 %v3455_v24, %v4306_v50  ;;  %v1864_v27 = vpop.f32.mrb[13].mxu0 }
 0x141   : > { %v3774_v29 = vpop.eup %3773  ;;  %v2404_v30 = vadd.f32 1.0, %v3772_v25  ;;  %3791 = vpow2.f32 %v3152_v23  ;;  %v3520_v32 = vadd.f32 %v1864_v27, %v4308_v51  ;;  %v3456_v33 = vpop.f32.mrb[14].mxu0 }
 0x142   : > { %v3776_v35 = vpop.eup %3775  ;;  %v2402_v37 = vadd.f32 1.0, %v3774_v29  ;;  %3793 = vpow2.f32 %v3150_v49  ;;  %v4407_v38 = vadd.f32 %v3519_v26, %v4349_v7  ;;  %v3521_v39 = vadd.f32 %v3456_v33, %v4310_v52  ;;  %v1867_v40 = vpop.f32.mrb[15].mxu0 }
 0x143   : > { %v3778_v41 = vpop.eup %3777  ;;  %3795 = vrcp.f32 %v2404_v30  ;;  %v2405_v50 = vadd.f32 1.0, %v3776_v35  ;;  %v4411_v42 = vadd.f32 %v3520_v32, %v4349_v7  ;;  %v3522_v43 = vadd.f32 %v1867_v40, %v4312_v53 }
 0x144   : > { %3797 = vrcp.f32 %v2402_v37  ;;  %v2403_v51 = vadd.f32 1.0, %v3778_v41  ;;  %v3155_v44 = vmul.f32 -1.442695, %v4407_v38  ;;  %v4416_v45 = vadd.f32 %v3521_v39, %v4349_v7 }
 0x145   : > { %v3780_v6 = vpop.eup %3779  ;;  %3799 = vrcp.f32 %v2405_v50  ;;  %v3153_v52 = vmul.f32 -1.442695, %v4411_v42  ;;  %v4425_v8 = vadd.f32 %v3522_v43, %v4349_v7 }
 0x146   : > { %v3782_v53 = vpop.eup %3781  ;;  %v2592_v9 = vmul.f32 %v3780_v6, %v4352_v12  ;;  %3801 = vrcp.f32 %v2403_v51  ;;  %v3156_v11 = vmul.f32 -1.442695, %v4416_v45 }
 0x147   : > { %v3784_v13 = vpop.eup %3783  ;;  %v2590_v14 = vmul.f32 %v3782_v53, %v4355_v15  ;;  %3803 = vpow2.f32 %v3155_v44  ;;  %v3154_v16 = vmul.f32 -1.442695, %v4425_v8  ;;  %v3459_v17 = vpop.f32.mrb[16].mxu0 }
 0x148   : > { %v3786_v19 = vpop.eup %3785  ;;  %2656 = vst [vmem:[%s4421_s4 + $0x10] sm:$0xff] %v2592_v9  ;;  %v2593_v47 = vmul.f32 %v3784_v13, %v4359_v18  ;;  %3805 = vpow2.f32 %v3153_v52  ;;  %v3523_v22 = vadd.f32 %v3459_v17, %v4314_v54  ;;  %v1880_v12 = vpop.f32.mrb[17].mxu0 }
 0x149   : > { %v3788_v23 = vpop.eup %3787  ;;  %2654 = vst [vmem:[%s4421_s4] sm:$0xff] %v2590_v14  ;;  %v2591_v49 = vmul.f32 %v3786_v19, %v4363_v20  ;;  %3807 = vpow2.f32 %v3156_v11  ;;  %v3524_v15 = vadd.f32 %v1880_v12, %v4316_v55  ;;  %v3460_v24 = vpop.f32.mrb[18].mxu0 }
 0x14a   : > { %v3790_v25 = vpop.eup %3789  ;;  %2657 = vst [vmem:[%s4421_s4 + $0x18] sm:$0xff] %v2593_v47  ;;  %v2408_v26 = vadd.f32 1.0, %v3788_v23  ;;  %3809 = vpow2.f32 %v3154_v16  ;;  %v4439_v27 = vadd.f32 %v3523_v22, %v4349_v7  ;;  %v3525_v18 = vadd.f32 %v3460_v24, %v4318_v56  ;;  %v1883_v54 = vpop.f32.mrb[19].mxu0 }
 0x14b   : > { %v3792_v29 = vpop.eup %3791  ;;  %2655 = vst [vmem:[%s4421_s4 + $0x8] sm:$0xff] %v2591_v49  ;;  %v2406_v30 = vadd.f32 1.0, %v3790_v25  ;;  %v4444_v32 = vadd.f32 %v3524_v15, %v4349_v7  ;;  %v3526_v20 = vadd.f32 %v1883_v54, %v4320_v57 }
 0x14c   : > { %v3794_v55 = vpop.eup %3793  ;;  %3811 = vrcp.f32 %v2408_v26  ;;  %v2409_v33 = vadd.f32 1.0, %v3792_v29  ;;  %v3159_v35 = vmul.f32 -1.442695, %v4439_v27  ;;  %v4449_v37 = vadd.f32 %v3525_v18, %v4349_v7 }
 0x14d   : > { %v3796_v39 = vpop.eup %3795  ;;  %3813 = vrcp.f32 %v2406_v30  ;;  %v2407_v56 = vadd.f32 1.0, %v3794_v55  ;;  %v3157_v40 = vmul.f32 -1.442695, %v4444_v32  ;;  %v4453_v41 = vadd.f32 %v3526_v20, %v4349_v7 }
 0x14e   : > { %v3798_v50 = vpop.eup %3797  ;;  %v2596_v57 = vmul.f32 %v3796_v39, %v4368_v28  ;;  %3815 = vrcp.f32 %v2409_v33  ;;  %v3160_v43 = vmul.f32 -1.442695, %v4449_v37 }
 0x14f   : > { %v3800_v51 = vpop.eup %3799  ;;  %v2594_v44 = vmul.f32 %v3798_v50, %v4371_v31  ;;  %3817 = vrcp.f32 %v2407_v56  ;;  %v3158_v6 = vmul.f32 -1.442695, %v4453_v41  ;;  %v3463_v52 = vpop.f32.mrb[20].mxu0 }
 0x150   : > { %v3802_v53 = vpop.eup %3801  ;;  %2660 = vst [vmem:[%s4421_s4 + $0x30] sm:$0xff] %v2596_v57  ;;  %v2597_v9 = vmul.f32 %v3800_v51, %v4375_v34  ;;  %3819 = vpow2.f32 %v3159_v35  ;;  %v3527_v11 = vadd.f32 %v3463_v52, %v4322_v58  ;;  %v1896_v28 = vpop.f32.mrb[21].mxu0 }
 0x151   : > { %v3804_v13 = vpop.eup %3803  ;;  %2658 = vst [vmem:[%s4421_s4 + $0x20] sm:$0xff] %v2594_v44  ;;  %v2595_v14 = vmul.f32 %v3802_v53, %v4379_v36  ;;  %3821 = vpow2.f32 %v3157_v40  ;;  %v3528_v31 = vadd.f32 %v1896_v28, %v4324_v59  ;;  %v3464_v16 = vpop.f32.mrb[22].mxu0 }
 0x152   : > { %v3806_v17 = vpop.eup %3805  ;;  %2661 = vst [vmem:[%s4421_s4 + $0x38] sm:$0xff] %v2597_v9  ;;  %v2412_v19 = vadd.f32 1.0, %v3804_v13  ;;  %3823 = vpow2.f32 %v3160_v43  ;;  %v4467_v47 = vadd.f32 %v3527_v11, %v4349_v7  ;;  %v3529_v34 = vadd.f32 %v3464_v16, %v4326_v60  ;;  %v1899_v58 = vpop.f32.mrb[23].mxu0 }
 0x153   : > { %v3808_v22 = vpop.eup %3807  ;;  %2659 = vst [vmem:[%s4421_s4 + $0x28] sm:$0xff] %v2595_v14  ;;  %v2410_v12 = vadd.f32 1.0, %v3806_v17  ;;  %3825 = vpow2.f32 %v3158_v6  ;;  %v4472_v36 = vadd.f32 %v3528_v31, %v4349_v7  ;;  %v3530_v59 = vadd.f32 %v1899_v58, %v4328_v61 }
 0x154   : > { %v3810_v23 = vpop.eup %3809  ;;  %3827 = vrcp.f32 %v2412_v19  ;;  %v2413_v49 = vadd.f32 1.0, %v3808_v22  ;;  %v3163_v15 = vmul.f32 -1.442695, %v4467_v47  ;;  %v4477_v24 = vadd.f32 %v3529_v34, %v4349_v7 }
 0x155   : > { %3829 = vrcp.f32 %v2410_v12  ;;  %v2411_v60 = vadd.f32 1.0, %v3810_v23  ;;  %v3161_v25 = vmul.f32 -1.442695, %v4472_v36  ;;  %v4481_v26 = vadd.f32 %v3530_v59, %v4349_v7 }
 0x156   : > { %v3812_v18 = vpop.eup %3811  ;;  %3831 = vrcp.f32 %v2413_v49  ;;  %v3164_v61 = vmul.f32 -1.442695, %v4477_v24 }
 0x157   : > { %v3814_v54 = vpop.eup %3813  ;;  %v2600_v29 = vmul.f32 %v3812_v18, %v4386_v10  ;;  %3833 = vrcp.f32 %v2411_v60  ;;  %v3162_v30 = vmul.f32 -1.442695, %v4481_v26  ;;  %v3467_v20 = vpop.f32.mrb[24].mxu0 }
 0x158   : > { %v3816_v55 = vpop.eup %3815  ;;  %v2598_v33 = vmul.f32 %v3814_v54, %v4390_v46  ;;  %3835 = vpow2.f32 %v3163_v15  ;;  %v3531_v35 = vadd.f32 %v3467_v20, %v4330_v62  ;;  %v1912_v39 = vpop.f32.mrb[25].mxu0 }
 0x159   : > { %v3818_v56 = vpop.eup %3817  ;;  %2664 = vst [vmem:[%s4421_s4 + $0x50] sm:$0xff] %v2600_v29  ;;  %v2601_v40 = vmul.f32 %v3816_v55, %v4395_v21  ;;  %3837 = vpow2.f32 %v3161_v25  ;;  %v3532_v10 = vadd.f32 %v1912_v39, %v4332_v63  ;;  %v3468_v50 = vpop.f32.mrb[26].mxu0 }
 0x15a   : > { %v3820_v57 = vpop.eup %3819  ;;  %2662 = vst [vmem:[%s4421_s4 + $0x40] sm:$0xff] %v2598_v33  ;;  %v2599_v43 = vmul.f32 %v3818_v56, %v4399_v48  ;;  %3839 = vpow2.f32 %v3164_v61  ;;  %v4494_v46 = vadd.f32 %v3531_v35, %v4349_v7  ;;  %v3533_v62 = vadd.f32 %v3468_v50, %v4334_v0  ;;  %v1915_v51 = vpop.f32.mrb[27].mxu0 }
 0x15b   : > { %v3822_v44 = vpop.eup %3821  ;;  %2665 = vst [vmem:[%s4421_s4 + $0x58] sm:$0xff] %v2601_v40  ;;  %v2416_v6 = vadd.f32 1.0, %v3820_v57  ;;  %3841 = vpow2.f32 %v3162_v30  ;;  %v4499_v21 = vadd.f32 %v3532_v10, %v4349_v7  ;;  %v3534_v63 = vadd.f32 %v1915_v51, %v4336_v1 }
 0x15c   : > { %v3824_v52 = vpop.eup %3823  ;;  %2663 = vst [vmem:[%s4421_s4 + $0x48] sm:$0xff] %v2599_v43  ;;  %v2414_v53 = vadd.f32 1.0, %v3822_v44  ;;  %v4504_v48 = vadd.f32 %v3533_v62, %v4349_v7  ;;  %v3167_v0 = vmul.f32 -1.442695, %v4494_v46 }
 0x15d   : > { %v3826_v9 = vpop.eup %3825  ;;  %3843 = vrcp.f32 %v2416_v6  ;;  %v2417_v11 = vadd.f32 1.0, %v3824_v52  ;;  %v4508_v28 = vadd.f32 %v3534_v63, %v4349_v7  ;;  %v3165_v1 = vmul.f32 -1.442695, %v4499_v21 }
 0x15e   : > { %v3828_v13 = vpop.eup %3827  ;;  %3845 = vrcp.f32 %v2414_v53  ;;  %v2415_v14 = vadd.f32 1.0, %v3826_v9  ;;  %v3168_v17 = vmul.f32 -1.442695, %v4504_v48 }
 0x15f   : > { %v3830_v31 = vpop.eup %3829  ;;  %v2604_v16 = vmul.f32 %v3828_v13, %v4407_v38  ;;  %3847 = vrcp.f32 %v2417_v11  ;;  %v3471_v19 = vpop.f32.mrb[28].mxu0  ;;  %v3166_v22 = vmul.f32 -1.442695, %v4508_v28 }
 0x160   : > { %v3832_v34 = vpop.eup %3831  ;;  %v2602_v58 = vmul.f32 %v3830_v31, %v4411_v42  ;;  %3849 = vrcp.f32 %v2415_v14  ;;  %v3535_v12 = vadd.f32 %v3471_v19, %v4338_v2  ;;  %v1928_v59 = vpop.f32.mrb[29].mxu0 }
 0x161   : > { %v3834_v23 = vpop.eup %3833  ;;  %2668 = vst [vmem:[%s4421_s4 + $0x70] sm:$0xff] %v2604_v16  ;;  %v2605_v49 = vmul.f32 %v3832_v34, %v4416_v45  ;;  %3851 = vpow2.f32 %v3167_v0  ;;  %v3536_v38 = vadd.f32 %v1928_v59, %v4340_v3  ;;  %v3472_v15 = vpop.f32.mrb[30].mxu0 }
 0x162   : > { %v3836_v60 = vpop.eup %3835  ;;  %2666 = vst [vmem:[%s4421_s4 + $0x60] sm:$0xff] %v2602_v58  ;;  %v2603_v42 = vmul.f32 %v3834_v23, %v4425_v8  ;;  %3853 = vpow2.f32 %v3165_v1  ;;  %v4522_v25 = vadd.f32 %v3535_v12, %v4349_v7  ;;  %v3537_v2 = vadd.f32 %v3472_v15, %v4342_v4  ;;  %v1931_v18 = vpop.f32.mrb[31].mxu0 }
 0x163   : > { %v3838_v61 = vpop.eup %3837  ;;  %2669 = vst [vmem:[%s4421_s4 + $0x78] sm:$0xff] %v2605_v49  ;;  %v2420_v54 = vadd.f32 1.0, %v3836_v60  ;;  %3855 = vpow2.f32 %v3168_v17  ;;  %v4527_v45 = vadd.f32 %v3536_v38, %v4349_v7  ;;  %v3538_v3 = vadd.f32 %v1931_v18, %v4344_v5 }
 0x164   : > { %v3840_v29 = vpop.eup %3839  ;;  %2667 = vst [vmem:[%s4421_s4 + $0x68] sm:$0xff] %v2603_v42  ;;  %v2418_v30 = vadd.f32 1.0, %v3838_v61  ;;  %3857 = vpow2.f32 %v3166_v22  ;;  %v4532_v8 = vadd.f32 %v3537_v2, %v4349_v7  ;;  %v3171_v55 = vmul.f32 -1.442695, %v4522_v25 }
 0x165   : > { %v3842_v20 = vpop.eup %3841  ;;  %3859 = vrcp.f32 %v2420_v54  ;;  %v2421_v4 = vadd.f32 1.0, %v3840_v29  ;;  %v4536_v33 = vadd.f32 %v3538_v3, %v4349_v7  ;;  %v3169_v39 = vmul.f32 -1.442695, %v4527_v45 }
 0x166   : > { %3861 = vrcp.f32 %v2418_v30  ;;  %v2419_v35 = vadd.f32 1.0, %v3842_v20  ;;  %v3172_v40 = vmul.f32 -1.442695, %v4532_v8 }
 0x167   : > { %v3409_v5 = vpop.f32.mrb[32].mxu1  ;;  %v3844_v56 = vpop.eup %3843  ;;  %3863 = vrcp.f32 %v2421_v4  ;;  %v3170_v62 = vmul.f32 -1.442695, %v4536_v33 }
 0x168   : > { %v3475_v10 = vpop.f32.mrb[32].mxu0  ;;  %v1319_v50 = vpop.f32.mrb[33].mxu1  ;;  %v2608_v43 = vmul.f32 %v3844_v56, %v4439_v27  ;;  %3865 = vrcp.f32 %v2419_v35 }
 0x169   : > { %v3846_v57 = vpop.eup %3845  ;;  %v3539_v51 = vadd.f32 %v3475_v10, %v3409_v5  ;;  %v1944_v44 = vpop.f32.mrb[33].mxu0  ;;  %3867 = vpow2.f32 %v3171_v55 }
 0x16a   : > { %v3410_v6 = vpop.f32.mrb[34].mxu1  ;;  %v3848_v63 = vpop.eup %3847  ;;  %v2606_v52 = vmul.f32 %v3846_v57, %v4444_v32  ;;  %v3540_v53 = vadd.f32 %v1944_v44, %v1319_v50  ;;  %2672 = vst [vmem:[%s4421_s4 + $0x90] sm:$0xff] %v2608_v43  ;;  %3869 = vpow2.f32 %v3169_v39 }
 0x16b   : > { %v3476_v9 = vpop.f32.mrb[34].mxu0  ;;  %v1322_v11 = vpop.f32.mrb[35].mxu1  ;;  %v2609_v13 = vmul.f32 %v3848_v63, %v4449_v37  ;;  %v4546_v27 = vadd.f32 %v3539_v51, %v4349_v7  ;;  %3871 = vpow2.f32 %v3172_v40 }
 0x16c   : > { %v3850_v0 = vpop.eup %3849  ;;  %v3541_v14 = vadd.f32 %v3476_v9, %v3410_v6  ;;  %v1947_v1 = vpop.f32.mrb[35].mxu0  ;;  %2670 = vst [vmem:[%s4421_s4 + $0x80] sm:$0xff] %v2606_v52  ;;  %v4551_v16 = vadd.f32 %v3540_v53, %v4349_v7  ;;  %3873 = vpow2.f32 %v3170_v62 }
 0x16d   : > { %v3852_v31 = vpop.eup %3851  ;;  %v2607_v32 = vmul.f32 %v3850_v0, %v4453_v41  ;;  %v3542_v17 = vadd.f32 %v1947_v1, %v1322_v11  ;;  %2673 = vst [vmem:[%s4421_s4 + $0x98] sm:$0xff] %v2609_v13  ;;  %v3175_v23 = vmul.f32 -1.442695, %v4546_v27 }
 0x16e   : > { %v3854_v19 = vpop.eup %3853  ;;  %v2424_v34 = vadd.f32 1.0, %v3852_v31  ;;  %v4555_v37 = vadd.f32 %v3541_v14, %v4349_v7  ;;  %v3173_v60 = vmul.f32 -1.442695, %v4551_v16 }
 0x16f   : > { %v3856_v58 = vpop.eup %3855  ;;  %2671 = vst [vmem:[%s4421_s4 + $0x88] sm:$0xff] %v2607_v32  ;;  %v2422_v22 = vadd.f32 1.0, %v3854_v19  ;;  %v4559_v12 = vadd.f32 %v3542_v17, %v4349_v7  ;;  %v3413_v49 = vpop.f32.mrb[36].mxu1 }
 0x170   : > { %v3858_v59 = vpop.eup %3857  ;;  %3875 = vrcp.f32 %v2424_v34  ;;  %v2425_v41 = vadd.f32 1.0, %v3856_v58  ;;  %v3479_v42 = vpop.f32.mrb[36].mxu0  ;;  %v3176_v54 = vmul.f32 -1.442695, %v4555_v37 }
 0x171   : > { %v3860_v38 = vpop.eup %3859  ;;  %3877 = vrcp.f32 %v2422_v22  ;;  %v2423_v15 = vadd.f32 1.0, %v3858_v59  ;;  %v1335_v2 = vpop.f32.mrb[37].mxu1  ;;  %v3543_v3 = vadd.f32 %v3479_v42, %v3413_v49  ;;  %v3174_v55 = vmul.f32 -1.442695, %v4559_v12 }
 0x172   : > { %v3862_v18 = vpop.eup %3861  ;;  %v2612_v61 = vmul.f32 %v3860_v38, %v4467_v47  ;;  %3879 = vrcp.f32 %v2425_v41  ;;  %v1960_v29 = vpop.f32.mrb[37].mxu0 }
 0x173   : > { %v3414_v30 = vpop.f32.mrb[38].mxu1  ;;  %v3864_v20 = vpop.eup %3863  ;;  %v2610_v4 = vmul.f32 %v3862_v18, %v4472_v36  ;;  %3881 = vrcp.f32 %v2423_v15  ;;  %v3544_v35 = vadd.f32 %v1960_v29, %v1335_v2  ;;  %v4570_v40 = vadd.f32 %v3543_v3, %v4349_v7 }
 0x174   : > { %v3480_v39 = vpop.f32.mrb[38].mxu0  ;;  %v1338_v5 = vpop.f32.mrb[39].mxu1  ;;  %2676 = vst [vmem:[%s4421_s4 + $0xb0] sm:$0xff] %v2612_v61  ;;  %v2613_v47 = vmul.f32 %v3864_v20, %v4477_v24  ;;  %3883 = vpow2.f32 %v3175_v23 }
 0x175   : > { %v3866_v56 = vpop.eup %3865  ;;  %v3545_v10 = vadd.f32 %v3480_v39, %v3414_v30  ;;  %v1963_v50 = vpop.f32.mrb[39].mxu0  ;;  %2674 = vst [vmem:[%s4421_s4 + $0xa0] sm:$0xff] %v2610_v4  ;;  %3885 = vpow2.f32 %v3173_v60  ;;  %v4575_v43 = vadd.f32 %v3544_v35, %v4349_v7  ;;  %v3179_v9 = vmul.f32 -1.442695, %v4570_v40 }
 0x176   : > { %v3868_v57 = vpop.eup %3867  ;;  %v2611_v36 = vmul.f32 %v3866_v56, %v4481_v26  ;;  %v3546_v62 = vadd.f32 %v1963_v50, %v1338_v5  ;;  %2677 = vst [vmem:[%s4421_s4 + $0xb8] sm:$0xff] %v2613_v47  ;;  %3887 = vpow2.f32 %v3176_v54 }
 0x177   : > { %v3870_v51 = vpop.eup %3869  ;;  %v2428_v44 = vadd.f32 1.0, %v3868_v57  ;;  %v4579_v24 = vadd.f32 %v3545_v10, %v4349_v7  ;;  %3889 = vpow2.f32 %v3174_v55  ;;  %v3417_v11 = vpop.f32.mrb[40].mxu1  ;;  %v3177_v13 = vmul.f32 -1.442695, %v4575_v43 }
 0x178   : > { %v3872_v6 = vpop.eup %3871  ;;  %2675 = vst [vmem:[%s4421_s4 + $0xa8] sm:$0xff] %v2611_v36  ;;  %v2426_v63 = vadd.f32 1.0, %v3870_v51  ;;  %v4583_v52 = vadd.f32 %v3546_v62, %v4349_v7  ;;  %v3483_v14 = vpop.f32.mrb[40].mxu0 }
 0x179   : > { %v3874_v26 = vpop.eup %3873  ;;  %3891 = vrcp.f32 %v2428_v44  ;;  %v2429_v53 = vadd.f32 1.0, %v3872_v6  ;;  %v1351_v1 = vpop.f32.mrb[41].mxu1  ;;  %v3180_v32 = vmul.f32 -1.442695, %v4579_v24  ;;  %v3547_v17 = vadd.f32 %v3483_v14, %v3417_v11 }
 0x17a   : > { %3893 = vrcp.f32 %v2426_v63  ;;  %v2427_v0 = vadd.f32 1.0, %v3874_v26  ;;  %v3876_v31 = vpop.eup %3875  ;;  %v1976_v19 = vpop.f32.mrb[41].mxu0  ;;  %v3178_v59 = vmul.f32 -1.442695, %v4583_v52 }
 0x17b   : > { %3895 = vrcp.f32 %v2429_v53  ;;  %v3418_v34 = vpop.f32.mrb[42].mxu1  ;;  %v3878_v58 = vpop.eup %3877  ;;  %v2616_v22 = vmul.f32 %v3876_v31, %v4494_v46  ;;  %v3548_v41 = vadd.f32 %v1976_v19, %v1351_v1  ;;  %v4592_v60 = vadd.f32 %v3547_v17, %v4349_v7 }
 0x17c   : > { %3897 = vrcp.f32 %v2427_v0  ;;  %v3484_v23 = vpop.f32.mrb[42].mxu0  ;;  %v1354_v49 = vpop.f32.mrb[43].mxu1  ;;  %v2614_v15 = vmul.f32 %v3878_v58, %v4499_v21 }
 0x17d   : > { %v3880_v38 = vpop.eup %3879  ;;  %3899 = vpow2.f32 %v3179_v9  ;;  %v3549_v42 = vadd.f32 %v3484_v23, %v3418_v34  ;;  %v1979_v2 = vpop.f32.mrb[43].mxu0  ;;  %2680 = vst [vmem:[%s4421_s4 + $0xd0] sm:$0xff] %v2616_v22  ;;  %v4597_v61 = vadd.f32 %v3548_v41, %v4349_v7  ;;  %v3183_v29 = vmul.f32 -1.442695, %v4592_v60 }
 0x17e   : > { %v3882_v18 = vpop.eup %3881  ;;  %v2617_v46 = vmul.f32 %v3880_v38, %v4504_v48  ;;  %3901 = vpow2.f32 %v3177_v13  ;;  %v3550_v54 = vadd.f32 %v1979_v2, %v1354_v49  ;;  %2678 = vst [vmem:[%s4421_s4 + $0xc0] sm:$0xff] %v2614_v15 }
 0x17f   : > { %v3884_v3 = vpop.eup %3883  ;;  %v2615_v21 = vmul.f32 %v3882_v18, %v4508_v28  ;;  %3903 = vpow2.f32 %v3180_v32  ;;  %v4603_v30 = vadd.f32 %v3549_v42, %v4349_v7  ;;  %v3421_v39 = vpop.f32.mrb[44].mxu1  ;;  %v3181_v56 = vmul.f32 -1.442695, %v4597_v61 }
 0x180   : > { %v3886_v20 = vpop.eup %3885  ;;  %2681 = vst [vmem:[%s4421_s4 + $0xd8] sm:$0xff] %v2617_v46  ;;  %v2432_v4 = vadd.f32 1.0, %v3884_v3  ;;  %3905 = vpow2.f32 %v3178_v59  ;;  %v4607_v48 = vadd.f32 %v3550_v54, %v4349_v7  ;;  %v3487_v47 = vpop.f32.mrb[44].mxu0 }
 0x181   : > { %v3888_v55 = vpop.eup %3887  ;;  %2679 = vst [vmem:[%s4421_s4 + $0xc8] sm:$0xff] %v2615_v21  ;;  %v2430_v35 = vadd.f32 1.0, %v3886_v20  ;;  %3907 = vpow2.f32 %v3183_v29  ;;  %v1367_v10 = vpop.f32.mrb[45].mxu1  ;;  %v3184_v36 = vmul.f32 -1.442695, %v4603_v30  ;;  %v3551_v62 = vadd.f32 %v3487_v47, %v3421_v39 }
 0x182   : > { %v3890_v5 = vpop.eup %3889  ;;  %3909 = vrcp.f32 %v2432_v4  ;;  %v2433_v28 = vadd.f32 1.0, %v3888_v55  ;;  %v1992_v51 = vpop.f32.mrb[45].mxu0  ;;  %v3182_v26 = vmul.f32 -1.442695, %v4607_v48 }
 0x183   : > { %v3892_v50 = vpop.eup %3891  ;;  %3911 = vrcp.f32 %v2430_v35  ;;  %v2431_v57 = vadd.f32 1.0, %v3890_v5  ;;  %v3422_v44 = vpop.f32.mrb[46].mxu1  ;;  %v3552_v53 = vadd.f32 %v1992_v51, %v1367_v10  ;;  %v4616_v14 = vadd.f32 %v3551_v62, %v4349_v7 }
 0x184   : > { %v3894_v6 = vpop.eup %3893  ;;  %v2620_v63 = vmul.f32 %v3892_v50, %v4522_v25  ;;  %3913 = vrcp.f32 %v2433_v28  ;;  %v3488_v9 = vpop.f32.mrb[46].mxu0 }
 0x185   : > { %v1370_v11 = vpop.f32.mrb[47].mxu1  ;;  %v3896_v0 = vpop.eup %3895  ;;  %v2618_v13 = vmul.f32 %v3894_v6, %v4527_v45  ;;  %3915 = vrcp.f32 %v2431_v57  ;;  %v3553_v1 = vadd.f32 %v3488_v9, %v3422_v44  ;;  %v4621_v17 = vadd.f32 %v3552_v53, %v4349_v7 }
 0x186   : > { %v1995_v31 = vpop.f32.mrb[47].mxu0  ;;  %v3898_v32 = vpop.eup %3897  ;;  %2684 = vst [vmem:[%s4421_s4 + $0xf0] sm:$0xff] %v2620_v63  ;;  %v2621_v25 = vmul.f32 %v3896_v0, %v4532_v8  ;;  %3917 = vpow2.f32 %v3181_v56  ;;  %v3187_v58 = vmul.f32 -1.442695, %v4616_v14 }
 0x187   : > { %v3554_v19 = vadd.f32 %v1995_v31, %v1370_v11  ;;  %v3900_v34 = vpop.eup %3899  ;;  %2682 = vst [vmem:[%s4421_s4 + $0xe0] sm:$0xff] %v2618_v13  ;;  %v2619_v45 = vmul.f32 %v3898_v32, %v4536_v33  ;;  %3919 = vpow2.f32 %v3184_v36  ;;  %v4627_v22 = vadd.f32 %v3553_v1, %v4349_v7  ;;  %v3425_v38 = vpop.f32.mrb[48].mxu1 }
 0x188   : > { %v3902_v59 = vpop.eup %3901  ;;  %2685 = vst [vmem:[%s4421_s4 + $0xf8] sm:$0xff] %v2621_v25  ;;  %v2436_v41 = vadd.f32 1.0, %v3900_v34  ;;  %3921 = vpow2.f32 %v3182_v26  ;;  %v3185_v42 = vmul.f32 -1.442695, %v4621_v17  ;;  %v3491_v2 = vpop.f32.mrb[48].mxu0 }
 0x189   : > { %v4631_v8 = vadd.f32 %v3554_v19, %v4349_v7  ;;  %v3904_v23 = vpop.eup %3903  ;;  %2683 = vst [vmem:[%s4421_s4 + $0xe8] sm:$0xff] %v2619_v45  ;;  %v2434_v49 = vadd.f32 1.0, %v3902_v59  ;;  %3923 = vpow2.f32 %v3187_v58  ;;  %v1383_v18 = vpop.f32.mrb[49].mxu1  ;;  %v3188_v3 = vmul.f32 -1.442695, %v4627_v22 }
 0x18a   : > { %v3906_v15 = vpop.eup %3905  ;;  %3925 = vrcp.f32 %v2436_v41  ;;  %v2437_v33 = vadd.f32 1.0, %v3904_v23  ;;  %v3555_v21 = vadd.f32 %v3491_v2, %v3425_v38  ;;  %v2008_v29 = vpop.f32.mrb[49].mxu0  ;;  %v4665_v2 = vld [vmem:[%s4781_s2] ss:$0 sm:$0xff] }
 0x18b   : > { %v3908_v46 = vpop.eup %3907  ;;  %3927 = vrcp.f32 %v2434_v49  ;;  %v2435_v54 = vadd.f32 1.0, %v3906_v15  ;;  %v3426_v20 = vpop.f32.mrb[50].mxu1  ;;  %v3186_v35 = vmul.f32 -1.442695, %v4631_v8  ;;  %v3556_v39 = vadd.f32 %v2008_v29, %v1383_v18 }
 0x18c   : > { %v3910_v4 = vpop.eup %3909  ;;  %3929 = vrcp.f32 %v2437_v33  ;;  %v2440_v55 = vadd.f32 1.0, %v3908_v46  ;;  %v3492_v5 = vpop.f32.mrb[50].mxu0  ;;  %v4639_v10 = vadd.f32 %v3555_v21, %v4349_v7 }
 0x18d   : > { %v1386_v28 = vpop.f32.mrb[51].mxu1  ;;  %v3912_v56 = vpop.eup %3911  ;;  %v2624_v47 = vmul.f32 %v3910_v4, %v4546_v27  ;;  %3931 = vrcp.f32 %v2435_v54  ;;  %v3557_v50 = vadd.f32 %v3492_v5, %v3426_v20  ;;  %v4643_v51 = vadd.f32 %v3556_v39, %v4349_v7 }
 0x18e   : > { %v2011_v57 = vpop.f32.mrb[51].mxu0  ;;  %v3914_v36 = vpop.eup %3913  ;;  %v2622_v62 = vmul.f32 %v3912_v56, %v4551_v16  ;;  %3933 = vrcp.f32 %v2440_v55  ;;  %v3191_v63 = vmul.f32 -1.442695, %v4639_v10 }
 0x18f   : > { %v3558_v44 = vadd.f32 %v2011_v57, %v1386_v28  ;;  %v3916_v6 = vpop.eup %3915  ;;  %2688 = vst [vmem:[%s4421_s4 + $0x110] sm:$0xff] %v2624_v47  ;;  %v2625_v27 = vmul.f32 %v3914_v36, %v4555_v37  ;;  %3935 = vpow2.f32 %v3185_v42  ;;  %v4649_v26 = vadd.f32 %v3557_v50, %v4349_v7  ;;  %v3429_v13 = vpop.f32.mrb[52].mxu1 }
 0x190   : > { %v3918_v53 = vpop.eup %3917  ;;  %2686 = vst [vmem:[%s4421_s4 + $0x100] sm:$0xff] %v2622_v62  ;;  %v2623_v16 = vmul.f32 %v3916_v6, %v4559_v12  ;;  %3937 = vpow2.f32 %v3188_v3  ;;  %v3189_v31 = vmul.f32 -1.442695, %v4643_v51  ;;  %v3495_v32 = vpop.f32.mrb[52].mxu0 }
 0x191   : > { %v4654_v9 = vadd.f32 %v3558_v44, %v4349_v7  ;;  %v3920_v11 = vpop.eup %3919  ;;  %2689 = vst [vmem:[%s4421_s4 + $0x118] sm:$0xff] %v2625_v27  ;;  %v2438_v0 = vadd.f32 1.0, %v3918_v53  ;;  %3939 = vpow2.f32 %v3186_v35  ;;  %v1399_v25 = vpop.f32.mrb[53].mxu1  ;;  %v3192_v34 = vmul.f32 -1.442695, %v4649_v26 }
 0x192   : > { %v3922_v37 = vpop.eup %3921  ;;  %2687 = vst [vmem:[%s4421_s4 + $0x108] sm:$0xff] %v2623_v16  ;;  %v2441_v1 = vadd.f32 1.0, %v3920_v11  ;;  %3941 = vpow2.f32 %v3191_v63  ;;  %v3559_v7 = vadd.f32 %v3495_v32, %v3429_v13  ;;  %v2024_v45 = vpop.f32.mrb[53].mxu0 }
 0x193   : > { %v3924_v19 = vpop.eup %3923  ;;  %3943 = vrcp.f32 %v2438_v0  ;;  %v2439_v12 = vadd.f32 1.0, %v3922_v37  ;;  %v3430_v58 = vpop.f32.mrb[54].mxu1  ;;  %v3190_v23 = vmul.f32 -1.442695, %v4654_v9  ;;  %v3560_v49 = vadd.f32 %v2024_v45, %v1399_v25 }
 0x194   : > { %v3926_v59 = vpop.eup %3925  ;;  %3945 = vrcp.f32 %v2441_v1  ;;  %v2444_v41 = vadd.f32 1.0, %v3924_v19  ;;  %v3496_v38 = vpop.f32.mrb[54].mxu0  ;;  %v4668_v18 = vadd.f32 %v4665_v2, %v3559_v7 }
 0x195   : > { %v1402_v15 = vpop.f32.mrb[55].mxu1  ;;  %v3928_v33 = vpop.eup %3927  ;;  %v2628_v42 = vmul.f32 %v3926_v59, %v4570_v40  ;;  %3947 = vrcp.f32 %v2439_v12  ;;  %v3561_v46 = vadd.f32 %v3496_v38, %v3430_v58  ;;  %v4672_v29 = vadd.f32 %v4665_v2, %v3560_v49 }
 0x196   : > { %v2027_v54 = vpop.f32.mrb[55].mxu0  ;;  %v3930_v3 = vpop.eup %3929  ;;  %v2626_v21 = vmul.f32 %v3928_v33, %v4575_v43  ;;  %3949 = vrcp.f32 %v2444_v41  ;;  %v3195_v55 = vmul.f32 -1.442695, %v4668_v18 }
 0x197   : > { %v3562_v40 = vadd.f32 %v2027_v54, %v1402_v15  ;;  %v3932_v20 = vpop.eup %3931  ;;  %2692 = vst [vmem:[%s4421_s4 + $0x130] sm:$0xff] %v2628_v42  ;;  %v2629_v4 = vmul.f32 %v3930_v3, %v4579_v24  ;;  %3951 = vpow2.f32 %v3189_v31  ;;  %v4678_v35 = vadd.f32 %v4665_v2, %v3561_v46  ;;  %v3433_v47 = vpop.f32.mrb[56].mxu1 }
 0x198   : > { %v3934_v39 = vpop.eup %3933  ;;  %2690 = vst [vmem:[%s4421_s4 + $0x120] sm:$0xff] %v2626_v21  ;;  %v2627_v43 = vmul.f32 %v3932_v20, %v4583_v52  ;;  %3953 = vpow2.f32 %v3192_v34  ;;  %v3193_v5 = vmul.f32 -1.442695, %v4672_v29  ;;  %v3499_v36 = vpop.f32.mrb[56].mxu0 }
 0x199   : > { %v4684_v28 = vadd.f32 %v4665_v2, %v3562_v40  ;;  %v3936_v56 = vpop.eup %3935  ;;  %2693 = vst [vmem:[%s4421_s4 + $0x138] sm:$0xff] %v2629_v4  ;;  %v2632_v24 = vmul.f32 %v3934_v39, %v4592_v60  ;;  %3955 = vpow2.f32 %v3190_v23  ;;  %v1415_v62 = vpop.f32.mrb[57].mxu1  ;;  %v3196_v6 = vmul.f32 -1.442695, %v4678_v35 }
 0x19a   : > { %v3938_v50 = vpop.eup %3937  ;;  %2691 = vst [vmem:[%s4421_s4 + $0x128] sm:$0xff] %v2627_v43  ;;  %v2442_v57 = vadd.f32 1.0, %v3936_v56  ;;  %3957 = vpow2.f32 %v3195_v55  ;;  %v3563_v27 = vadd.f32 %v3499_v36, %v3433_v47  ;;  %v2040_v63 = vpop.f32.mrb[57].mxu0 }
 0x19b   : > { %v3940_v52 = vpop.eup %3939  ;;  %2696 = vst [vmem:[%s4421_s4 + $0x150] sm:$0xff] %v2632_v24  ;;  %v2445_v44 = vadd.f32 1.0, %v3938_v50  ;;  %3959 = vpow2.f32 %v3193_v5  ;;  %v3434_v53 = vpop.f32.mrb[58].mxu1  ;;  %v3194_v11 = vmul.f32 -1.442695, %v4684_v28  ;;  %v3564_v0 = vadd.f32 %v2040_v63, %v1415_v62 }
 0x19c   : > { %v3942_v16 = vpop.eup %3941  ;;  %3961 = vrcp.f32 %v2442_v57  ;;  %v2443_v60 = vadd.f32 1.0, %v3940_v52  ;;  %v3500_v13 = vpop.f32.mrb[58].mxu0  ;;  %v4693_v32 = vadd.f32 %v4665_v2, %v3563_v27 }
 0x19d   : > { %v1418_v37 = vpop.f32.mrb[59].mxu1  ;;  %v3944_v1 = vpop.eup %3943  ;;  %3963 = vrcp.f32 %v2445_v44  ;;  %v2448_v31 = vadd.f32 1.0, %v3942_v16  ;;  %v3565_v25 = vadd.f32 %v3500_v13, %v3434_v53  ;;  %v4697_v7 = vadd.f32 %v4665_v2, %v3564_v0 }
 0x19e   : > { %v2043_v19 = vpop.f32.mrb[59].mxu0  ;;  %v3946_v12 = vpop.eup %3945  ;;  %v2630_v34 = vmul.f32 %v3944_v1, %v4597_v61  ;;  %3965 = vrcp.f32 %v2443_v60  ;;  %v3199_v41 = vmul.f32 -1.442695, %v4693_v32 }
 0x19f   : > { %v3566_v45 = vadd.f32 %v2043_v19, %v1418_v37  ;;  %v3948_v58 = vpop.eup %3947  ;;  %v2633_v59 = vmul.f32 %v3946_v12, %v4603_v30  ;;  %3967 = vrcp.f32 %v2448_v31  ;;  %v4702_v23 = vadd.f32 %v4665_v2, %v3565_v25  ;;  %v3437_v42 = vpop.f32.mrb[60].mxu1 }
 0x1a0   : > { %v3950_v49 = vpop.eup %3949  ;;  %2694 = vst [vmem:[%s4421_s4 + $0x140] sm:$0xff] %v2630_v34  ;;  %v2631_v61 = vmul.f32 %v3948_v58, %v4607_v48  ;;  %3969 = vpow2.f32 %v3196_v6  ;;  %v3197_v38 = vmul.f32 -1.442695, %v4697_v7  ;;  %v3503_v3 = vpop.f32.mrb[60].mxu0 }
 0x1a1   : > { %v4708_v15 = vadd.f32 %v4665_v2, %v3566_v45  ;;  %v3952_v33 = vpop.eup %3951  ;;  %2697 = vst [vmem:[%s4421_s4 + $0x158] sm:$0xff] %v2633_v59  ;;  %v2636_v30 = vmul.f32 %v3950_v49, %v4616_v14  ;;  %3971 = vpow2.f32 %v3194_v11  ;;  %v1431_v21 = vpop.f32.mrb[61].mxu1  ;;  %v3200_v20 = vmul.f32 -1.442695, %v4702_v23 }
 0x1a2   : > { %v3954_v46 = vpop.eup %3953  ;;  %2695 = vst [vmem:[%s4421_s4 + $0x148] sm:$0xff] %v2631_v61  ;;  %v2446_v54 = vadd.f32 1.0, %v3952_v33  ;;  %3973 = vpow2.f32 %v3199_v41  ;;  %v3567_v4 = vadd.f32 %v3503_v3, %v3437_v42  ;;  %v2056_v55 = vpop.f32.mrb[61].mxu0 }
 0x1a3   : > { %v3956_v48 = vpop.eup %3955  ;;  %2700 = vst [vmem:[%s4421_s4 + $0x170] sm:$0xff] %v2636_v30  ;;  %v2449_v40 = vadd.f32 1.0, %v3954_v46  ;;  %3975 = vpow2.f32 %v3197_v38  ;;  %v3438_v39 = vpop.f32.mrb[62].mxu1  ;;  %v3198_v5 = vmul.f32 -1.442695, %v4708_v15  ;;  %v3568_v56 = vadd.f32 %v2056_v55, %v1431_v21 }
 0x1a4   : > { %v3958_v43 = vpop.eup %3957  ;;  %3977 = vrcp.f32 %v2446_v54  ;;  %v2447_v14 = vadd.f32 1.0, %v3956_v48  ;;  %v3504_v24 = vpop.f32.mrb[62].mxu0  ;;  %v4717_v36 = vadd.f32 %v4665_v2, %v3567_v4 }
 0x1a5   : > { %v1434_v47 = vpop.f32.mrb[63].mxu1  ;;  %v3960_v50 = vpop.eup %3959  ;;  %3979 = vrcp.f32 %v2449_v40  ;;  %v2452_v57 = vadd.f32 1.0, %v3958_v43  ;;  %v3569_v62 = vadd.f32 %v3504_v24, %v3438_v39  ;;  %v4720_v27 = vadd.f32 %v4665_v2, %v3568_v56 }
 0x1a6   : > { %v2059_v52 = vpop.f32.mrb[63].mxu0  ;;  %v3962_v44 = vpop.eup %3961  ;;  %3981 = vrcp.f32 %v2447_v14  ;;  %v2450_v6 = vadd.f32 1.0, %v3960_v50  ;;  %v3203_v60 = vmul.f32 -1.442695, %v4717_v36 }
 0x1a7   : > { %v3570_v63 = vadd.f32 %v2059_v52, %v1434_v47  ;;  %v3964_v53 = vpop.eup %3963  ;;  %v2634_v16 = vmul.f32 %v3962_v44, %v4621_v17  ;;  %3983 = vrcp.f32 %v2452_v57  ;;  %v3201_v13 = vmul.f32 -1.442695, %v4720_v27 }
 0x1a8   : > { %v3966_v11 = vpop.eup %3965  ;;  %v2637_v0 = vmul.f32 %v3964_v53, %v4627_v22  ;;  %3985 = vrcp.f32 %v2450_v6  ;;  %v4729_v31 = vadd.f32 %v4665_v2, %v3569_v62 }
 0x1a9   : > { %v3968_v37 = vpop.eup %3967  ;;  %2698 = vst [vmem:[%s4421_s4 + $0x160] sm:$0xff] %v2634_v16  ;;  %v2635_v1 = vmul.f32 %v3966_v11, %v4631_v8  ;;  %3987 = vpow2.f32 %v3200_v20  ;;  %v4734_v19 = vadd.f32 %v4665_v2, %v3570_v63 }
 0x1aa   : > { %v3970_v17 = vpop.eup %3969  ;;  %2701 = vst [vmem:[%s4421_s4 + $0x178] sm:$0xff] %v2637_v0  ;;  %v2640_v25 = vmul.f32 %v3968_v37, %v4639_v10  ;;  %3989 = vpow2.f32 %v3198_v5  ;;  %v3204_v59 = vmul.f32 -1.442695, %v4729_v31 }
 0x1ab   : > { %v3972_v22 = vpop.eup %3971  ;;  %2699 = vst [vmem:[%s4421_s4 + $0x168] sm:$0xff] %v2635_v1  ;;  %v2453_v12 = vadd.f32 1.0, %v3970_v17  ;;  %3991 = vpow2.f32 %v3203_v60  ;;  %v3202_v2 = vmul.f32 -1.442695, %v4734_v19 }
 0x1ac   : > { %v3974_v34 = vpop.eup %3973  ;;  %2704 = vst [vmem:[%s4421_s4 + $0x190] sm:$0xff] %v2640_v25  ;;  %v2451_v45 = vadd.f32 1.0, %v3972_v22  ;;  %3993 = vpow2.f32 %v3201_v13 }
 0x1ad   : > { %v3976_v8 = vpop.eup %3975  ;;  %3995 = vrcp.f32 %v2453_v12  ;;  %v2456_v58 = vadd.f32 1.0, %v3974_v34 }
 0x1ae   : > { %v3978_v10 = vpop.eup %3977  ;;  %3997 = vrcp.f32 %v2451_v45  ;;  %v2454_v41 = vadd.f32 1.0, %v3976_v8 }
 0x1af   : > { %v3980_v49 = vpop.eup %3979  ;;  %v2638_v61 = vmul.f32 %v3978_v10, %v4643_v51  ;;  %3999 = vrcp.f32 %v2456_v58 }
 0x1b0   : > { %v3982_v38 = vpop.eup %3981  ;;  %v2641_v33 = vmul.f32 %v3980_v49, %v4649_v26  ;;  %4001 = vrcp.f32 %v2454_v41 }
 0x1b1   : > { %v3984_v30 = vpop.eup %3983  ;;  %2702 = vst [vmem:[%s4421_s4 + $0x180] sm:$0xff] %v2638_v61  ;;  %v2639_v42 = vmul.f32 %v3982_v38, %v4654_v9  ;;  %4003 = vpow2.f32 %v3204_v59 }
 0x1b2   : > { %v3986_v46 = vpop.eup %3985  ;;  %2705 = vst [vmem:[%s4421_s4 + $0x198] sm:$0xff] %v2641_v33  ;;  %v2644_v54 = vmul.f32 %v3984_v30, %v4668_v18  ;;  %4005 = vpow2.f32 %v3202_v2 }
 0x1b3   : > { %v3988_v3 = vpop.eup %3987  ;;  %2703 = vst [vmem:[%s4421_s4 + $0x188] sm:$0xff] %v2639_v42  ;;  %v2642_v51 = vmul.f32 %v3986_v46, %v4672_v29 }
 0x1b4   : > { %v3990_v21 = vpop.eup %3989  ;;  %2708 = vst [vmem:[%s4421_s4 + $0x1b0] sm:$0xff] %v2644_v54  ;;  %v2457_v48 = vadd.f32 1.0, %v3988_v3 }
 0x1b5   : > { %v3992_v26 = vpop.eup %3991  ;;  %2706 = vst [vmem:[%s4421_s4 + $0x1a0] sm:$0xff] %v2642_v51  ;;  %v2455_v40 = vadd.f32 1.0, %v3990_v21 }
 0x1b6   : > { %v3994_v20 = vpop.eup %3993  ;;  %4007 = vrcp.f32 %v2457_v48  ;;  %v2460_v9 = vadd.f32 1.0, %v3992_v26 }
 0x1b7   : > { %v3996_v4 = vpop.eup %3995  ;;  %4009 = vrcp.f32 %v2455_v40  ;;  %v2458_v18 = vadd.f32 1.0, %v3994_v20 }
 0x1b8   : > { %v3998_v55 = vpop.eup %3997  ;;  %v2645_v39 = vmul.f32 %v3996_v4, %v4678_v35  ;;  %4011 = vrcp.f32 %v2460_v9 }
 0x1b9   : > { %v4000_v29 = vpop.eup %3999  ;;  %v2643_v43 = vmul.f32 %v3998_v55, %v4684_v28  ;;  %4013 = vrcp.f32 %v2458_v18 }
 0x1ba   : > { %v4002_v14 = vpop.eup %4001  ;;  %2709 = vst [vmem:[%s4421_s4 + $0x1b8] sm:$0xff] %v2645_v39  ;;  %v2648_v5 = vmul.f32 %v4000_v29, %v4693_v32 }
 0x1bb   : > { %v4004_v56 = vpop.eup %4003  ;;  %2707 = vst [vmem:[%s4421_s4 + $0x1a8] sm:$0xff] %v2643_v43  ;;  %v2646_v24 = vmul.f32 %v4002_v14, %v4697_v7 }
 0x1bc   : > { %v4006_v47 = vpop.eup %4005  ;;  %2712 = vst [vmem:[%s4421_s4 + $0x1d0] sm:$0xff] %v2648_v5  ;;  %v2461_v50 = vadd.f32 1.0, %v4004_v56 }
 0x1bd   : > { %2710 = vst [vmem:[%s4421_s4 + $0x1c0] sm:$0xff] %v2646_v24  ;;  %v2459_v35 = vadd.f32 1.0, %v4006_v47 }
 0x1be   : > { %4015 = vrcp.f32 %v2461_v50 }
 0x1bf   : > { %4017 = vrcp.f32 %v2459_v35 }
 0x1c0   : > { %v4008_v28 = vpop.eup %4007 }
 0x1c1   : > { %v4010_v57 = vpop.eup %4009  ;;  %v2649_v32 = vmul.f32 %v4008_v28, %v4702_v23 }
 0x1c2   : > { %v4012_v62 = vpop.eup %4011  ;;  %v2647_v52 = vmul.f32 %v4010_v57, %v4708_v15 }
 0x1c3   : > { %v4014_v7 = vpop.eup %4013  ;;  %2713 = vst [vmem:[%s4421_s4 + $0x1d8] sm:$0xff] %v2649_v32  ;;  %v2652_v44 = vmul.f32 %v4012_v62, %v4717_v36 }
 0x1c4   : > { %2711 = vst [vmem:[%s4421_s4 + $0x1c8] sm:$0xff] %v2647_v52  ;;  %v2650_v6 = vmul.f32 %v4014_v7, %v4720_v27 }
 0x1c5   : > { %2716 = vst [vmem:[%s4421_s4 + $0x1f0] sm:$0xff] %v2652_v44 }
 0x1c6   : > { %2714 = vst [vmem:[%s4421_s4 + $0x1e0] sm:$0xff] %v2650_v6 }
 0x1c8   : > { %v4016_v63 = vpop.eup %4015 }
 0x1c9   : > { %v4018_v53 = vpop.eup %4017  ;;  %v2653_v16 = vmul.f32 %v4016_v63, %v4729_v31 }
 0x1ca   : > { %v2651_v60 = vmul.f32 %v4018_v53, %v4734_v19 }
 0x1cb   : > { %2717 = vst [vmem:[%s4421_s4 + $0x1f8] sm:$0xff] %v2653_v16 }
 0x1cc   : > { %2715 = vst [vmem:[%s4421_s4 + $0x1e8] sm:$0xff] %v2651_v60 }
 0x1cd PF: > { %s13_s14 = sadd.s32 1, %s4042_s14   ;;  %s4783_s12 = smov %s4038_s13 }
 0x1ce   : > { %p10_p5 = scmp.ge.s32.totalorder %s13_s14, 4   ;;  %s4784_s13 = smov %s4786_s15 }
 0x1d0   :  { %12 = sbr.rel (!%p10_p5) target bundleno = 2 (0x2), region = 67 }

</bundles_post_ra>
